<compile_context>
chip_gen: v6e
topology: v6e:2x2x1
jax: 0.10.0
libtpu: 0.0.40
codegen_flags: <defaults>
</compile_context>

<pallas_src>
import jax
import jax.numpy as jnp
from jax.experimental import pallas as pl
from jax.experimental.pallas import tpu as pltpu


def _conv_lstm_seq_kernel(xp_ref, wx_ref, wh_ref, b_ref, h_out_ref,
                          hpad_ref, hp_ref, c_ref):
    """One time step of the fused ConvLSTM recurrence (batch folded into M).

    xp_ref    : (1, B*H*W, 9*C) bf16  im2col patches of x_t, all batches
    wx_ref    : (9*C, 4*C)      bf16  flattened 3x3 input->gates weights
    wh_ref    : (9*C, 4*C)      bf16  flattened 3x3 hidden->gates weights
    b_ref     : (1, 4*C)        f32   fused gate bias [in, forget, out, cell]
    h_out_ref : (B*H*W, C)      f32   final hidden state (written at t == T-1)
    hpad_ref  : (B, H+2, W+2, C) f32  VMEM-resident zero-padded hidden state
    hp_ref    : (B*H*W, 9*C)    f32   VMEM scratch for the h im2col patches
    c_ref     : (B*H*W, C)      f32   VMEM-resident cell state
    """
    t = pl.program_id(0)
    n_t = pl.num_programs(0)

    B, Hp2, Wp2, C = hpad_ref.shape
    H, W = Hp2 - 2, Wp2 - 2
    M = B * H * W

    @pl.when(t == 0)
    def _():
        # Zero the whole padded buffer once; later steps only write the
        # interior, so the 1-pixel halo stays zero (implicit conv padding).
        hpad_ref[...] = jnp.zeros_like(hpad_ref)
        c_ref[...] = jnp.zeros_like(c_ref)

    # --- Build the h im2col (B*H*W, 9C) with 9 column-slice writes.
    h_pad = hpad_ref[...]                                        # (B,H+2,W+2,C)
    for k, (dy, dx) in enumerate((dy, dx) for dy in range(3) for dx in range(3)):
        patch = h_pad[:, dy:dy + H, dx:dx + W, :].reshape(M, C)
        hp_ref[:, k * C:(k + 1) * C] = patch

    # --- Gate pre-activations: two bf16 MXU matmuls with f32 accumulation.
    acc = jnp.dot(xp_ref[0], wx_ref[...],
                  preferred_element_type=jnp.float32)            # (M, 4C) f32
    acc = acc + jnp.dot(hp_ref[...].astype(jnp.bfloat16), wh_ref[...],
                        preferred_element_type=jnp.float32)
    acc = acc + b_ref[...]                                       # (1, 4C) bcast

    # Gate activations on contiguous slabs (order: in, forget, out, cell).
    sig = jax.nn.sigmoid(acc[:, :3 * C])
    g_g = jnp.tanh(acc[:, 3 * C:])
    i_g = sig[:, 0 * C:1 * C]
    f_g = sig[:, 1 * C:2 * C]
    o_g = sig[:, 2 * C:3 * C]

    c_new = f_g * c_ref[...] + i_g * g_g
    h_new = o_g * jnp.tanh(c_new)

    c_ref[...] = c_new
    hpad_ref[:, 1:H + 1, 1:W + 1, :] = h_new.reshape(B, H, W, C)

    @pl.when(t == n_t - 1)
    def _():
        h_out_ref[...] = h_new.astype(h_out_ref.dtype)


@jax.jit
def conv_lstm_sequence(x_tbchw, wx, wh, b):
    """Run the full ConvLSTM recurrence in a single pallas_call.

    x_tbchw : (T, B, C, H, W)  PyTorch NCHW per time step
    wx, wh  : (3, 3, C, 4*C)   HWIO, gates stacked [in, forget, out, cell]
    b       : (4*C,)
    Returns the final hidden state in NCHW: (B, C, H, W).
    """
    T, B, C, H, W = x_tbchw.shape
    C4 = 4 * C
    M = B * H * W

    # NCHW -> NHWC once for the whole sequence, pad once, im2col once.
    # TODO(synk): for large T on v5e the 9x im2col HBM blow-up of x could be
    # avoided by DMA-ing raw padded x tiles and building patches in-kernel.
    x_nhwc = jnp.transpose(x_tbchw, (0, 1, 3, 4, 2))             # (T,B,H,W,C)
    x_pad = jnp.pad(x_nhwc, ((0, 0), (0, 0), (1, 1), (1, 1), (0, 0)))
    cols = [x_pad[:, :, dy:dy + H, dx:dx + W, :].reshape(T, M, C)
            for dy in range(3) for dx in range(3)]
    x_patches = jnp.concatenate(cols, axis=-1).astype(jnp.bfloat16)  # (T,M,9C)

    wx_flat = wx.reshape(9 * C, C4).astype(jnp.bfloat16)
    wh_flat = wh.reshape(9 * C, C4).astype(jnp.bfloat16)
    b2 = b.reshape(1, C4).astype(jnp.float32)

    h_flat = pl.pallas_call(
        _conv_lstm_seq_kernel,
        out_shape=jax.ShapeDtypeStruct((M, C), jnp.float32),
        grid=(T,),
        in_specs=[
            pl.BlockSpec((1, M, 9 * C), lambda t: (t, 0, 0)),
            pl.BlockSpec((9 * C, C4), lambda t: (0, 0)),
            pl.BlockSpec((9 * C, C4), lambda t: (0, 0)),
            pl.BlockSpec((1, C4), lambda t: (0, 0)),
        ],
        out_specs=pl.BlockSpec((M, C), lambda t: (0, 0)),
        scratch_shapes=[
            pltpu.VMEM((B, H + 2, W + 2, C), jnp.float32),  # padded h state
            pltpu.VMEM((M, 9 * C), jnp.float32),            # h im2col buffer
            pltpu.VMEM((M, C), jnp.float32),                # cell state
        ],
        compiler_params=pltpu.CompilerParams(
            dimension_semantics=("arbitrary",)),   # serial recurrence over T
    )(x_patches, wx_flat, wh_flat, b2)

    return jnp.transpose(h_flat.reshape(B, H, W, C), (0, 3, 1, 2))   # NCHW


def set_values_forward(xinp, params, hidden_size, height, width):
    """Mirrors set_values.forward (with `seq` == identity).

    xinp: (T, B, hidden, H, W) in NCHW per time step (PyTorch convention).
    Returns (dropout(h_state) in NCHW, xout with xout[t] == xinp[t]).
    """
    del hidden_size, height, width  # derived from xinp's shape
    h_nchw = conv_lstm_sequence(xinp, params["wx"], params["wh"], params["b"])
    # TODO(synk): nn.Dropout(0.7) training-mode randomness cannot match torch
    # RNG; modeled as eval-mode identity (deterministic).
    h_drop = h_nchw
    xout = xinp          # `seq` is the identity, so xout is exactly xinp.
    return h_drop, xout


def _reference_conv_lstm(xinp, wx, wh, b):
    """Pure-JAX f32 reference of the ConvLSTM recurrence (for validation)."""
    T, B, C, H, W = xinp.shape
    w_cat = jnp.concatenate([wx, wh], axis=2)                    # (3,3,2C,4C)
    x_nhwc = jnp.transpose(xinp, (0, 1, 3, 4, 2)).astype(jnp.float32)
    h = jnp.zeros((B, H, W, C), jnp.float32)
    c = jnp.zeros((B, H, W, C), jnp.float32)
    for t in range(T):
        inp = jnp.concatenate([x_nhwc[t], h], axis=-1)           # (B,H,W,2C)
        gates = jax.lax.conv_general_dilated(
            inp, w_cat.astype(jnp.float32), window_strides=(1, 1),
            padding="SAME",
            dimension_numbers=("NHWC", "HWIO", "NHWC")) + b      # (B,H,W,4C)
        i = jax.nn.sigmoid(gates[..., 0 * C:1 * C])
        f = jax.nn.sigmoid(gates[..., 1 * C:2 * C])
        o = jax.nn.sigmoid(gates[..., 2 * C:3 * C])
        g = jnp.tanh(gates[..., 3 * C:4 * C])
        c = f * c + i * g
        h = o * jnp.tanh(c)
    return jnp.transpose(h, (0, 3, 1, 2))                        # NCHW


if __name__ == "__main__":
    key = jax.random.PRNGKey(0)
    T, B = 3, 2
    hidden, H, W = 8, 8, 8

    k1, k2, k3, k4 = jax.random.split(key, 4)
    # xinp matches the layout implied by the module: (T, B, hidden, H, W)
    xinp = jax.random.normal(k1, (T, B, hidden, H, W), dtype=jnp.float32)
    # Split gate weights: input->gates and hidden->gates, each (3,3,C,4C) HWIO,
    # gates stacked [in, forget, out, cell] along the output-channel axis.
    wx = 0.1 * jax.random.normal(k2, (3, 3, hidden, 4 * hidden), dtype=jnp.float32)
    wh = 0.1 * jax.random.normal(k3, (3, 3, hidden, 4 * hidden), dtype=jnp.float32)
    b = 0.1 * jax.random.normal(k4, (4 * hidden,), dtype=jnp.float32)
    params = {"wx": wx, "wh": wh, "b": b}

    h_drop, xout = set_values_forward(xinp, params, hidden, H, W)
    jax.block_until_ready((h_drop, xout))

    assert h_drop.shape == (B, hidden, H, W)
    assert xout.shape == (T, B, hidden, H, W)
    assert bool(jnp.all(jnp.isfinite(h_drop)))

    # Validate against a pure-JAX f32 reference (bf16 matmul operands in the
    # kernel => allow a small tolerance).
    h_ref = _reference_conv_lstm(xinp, wx, wh, b)
    max_err = float(jnp.max(jnp.abs(h_drop - h_ref)))
    assert max_err < 0.1, f"mismatch vs reference: max abs err = {max_err}"

    print("KERNEL_OK")
</pallas_src>

<mosaic_0001>
module attributes {stable_mosaic.version = 11 : i64} {
  func.func @_conv_lstm_seq_kernel(%arg0: i32, %arg1: memref<1x128x72xbf16, #tpu.memory_space<vmem>>, %arg2: memref<72x32xbf16, #tpu.memory_space<vmem>>, %arg3: memref<72x32xbf16, #tpu.memory_space<vmem>>, %arg4: memref<1x32xf32, #tpu.memory_space<vmem>>, %arg5: memref<128x8xf32, #tpu.memory_space<vmem>>, %arg6: memref<2x10x10x8xf32, #tpu.memory_space<vmem>>, %arg7: memref<128x72xf32, #tpu.memory_space<vmem>>, %arg8: memref<128x8xf32, #tpu.memory_space<vmem>>) attributes {dimension_semantics = [#tpu.dimension_semantics<arbitrary>], iteration_bounds = array<i64: 3>, scalar_prefetch = 0 : i64, scratch_operands = 3 : i64, tpu.core_type = #tpu.core_type<tc>, window_params = [{transform_indices = @transform_0, window_bounds = array<i64: 1, 128, 72>}, {pipeline_mode = #tpu.pipeline_mode<synchronous>, transform_indices = @transform_1, window_bounds = array<i64: 72, 32>}, {pipeline_mode = #tpu.pipeline_mode<synchronous>, transform_indices = @transform_2, window_bounds = array<i64: 72, 32>}, {pipeline_mode = #tpu.pipeline_mode<synchronous>, transform_indices = @transform_3, window_bounds = array<i64: 1, 32>}, {pipeline_mode = #tpu.pipeline_mode<synchronous>, transform_indices = @transform_4, window_bounds = array<i64: 128, 8>}]} {
    %c0_i32 = arith.constant 0 : i32
    %0 = arith.cmpi eq, %arg0, %c0_i32 : i32
    %1 = arith.extui %0 : i1 to i32
    %c0_i32_0 = arith.constant 0 : i32
    %2 = arith.cmpi ne, %1, %c0_i32_0 : i32
    scf.if %2 {
      %cst_35 = arith.constant 0.000000e+00 : f32
      %66 = vector.broadcast %cst_35 : f32 to vector<2x10x10x8xf32>
      %c0_36 = arith.constant 0 : index
      %c0_37 = arith.constant 0 : index
      %c0_38 = arith.constant 0 : index
      %c0_39 = arith.constant 0 : index
      %67 = vector.load %arg6[%c0_36, %c0_37, %c0_38, %c0_39] : memref<2x10x10x8xf32, #tpu.memory_space<vmem>>, vector<2x10x10x8xf32>
      tpu.vector_store %arg6[%c0_36, %c0_37, %c0_38, %c0_39], %66 {strides = array<i32>} : memref<2x10x10x8xf32, #tpu.memory_space<vmem>>, vector<2x10x10x8xf32>,
      %cst_40 = arith.constant 0.000000e+00 : f32
      %68 = vector.broadcast %cst_40 : f32 to vector<128x8xf32>
      %c0_41 = arith.constant 0 : index
      %c0_42 = arith.constant 0 : index
      %69 = vector.load %arg8[%c0_41, %c0_42] : memref<128x8xf32, #tpu.memory_space<vmem>>, vector<128x8xf32>
      tpu.vector_store %arg8[%c0_41, %c0_42], %68 {strides = array<i32>} : memref<128x8xf32, #tpu.memory_space<vmem>>, vector<128x8xf32>,
    } else {
    }
    %c0 = arith.constant 0 : index
    %c0_1 = arith.constant 0 : index
    %c0_2 = arith.constant 0 : index
    %c0_3 = arith.constant 0 : index
    %3 = vector.load %arg6[%c0, %c0_1, %c0_2, %c0_3] : memref<2x10x10x8xf32, #tpu.memory_space<vmem>>, vector<2x10x10x8xf32>
    %4 = vector.extract_strided_slice %3 {offsets = [0, 0, 0, 0], sizes = [2, 8, 8, 8], strides = [1, 1, 1, 1]} : vector<2x10x10x8xf32> to vector<2x8x8x8xf32>
    %5 = vector.shape_cast %4 : vector<2x8x8x8xf32> to vector<128x8xf32>
    %c0_4 = arith.constant 0 : index
    %c0_5 = arith.constant 0 : index
    %6 = vector.load %arg7[%c0_4, %c0_5] : memref<128x72xf32, #tpu.memory_space<vmem>>, vector<128x8xf32>
    tpu.vector_store %arg7[%c0_4, %c0_5], %5 {strides = array<i32>} : memref<128x72xf32, #tpu.memory_space<vmem>>, vector<128x8xf32>,
    %7 = vector.extract_strided_slice %3 {offsets = [0, 0, 1, 0], sizes = [2, 8, 8, 8], strides = [1, 1, 1, 1]} : vector<2x10x10x8xf32> to vector<2x8x8x8xf32>
    %8 = vector.shape_cast %7 : vector<2x8x8x8xf32> to vector<128x8xf32>
    %c0_6 = arith.constant 0 : index
    %c8 = arith.constant 8 : index
    %9 = vector.load %arg7[%c0_6, %c8] : memref<128x72xf32, #tpu.memory_space<vmem>>, vector<128x8xf32>
    tpu.vector_store %arg7[%c0_6, %c8], %8 {strides = array<i32>} : memref<128x72xf32, #tpu.memory_space<vmem>>, vector<128x8xf32>,
    %10 = vector.extract_strided_slice %3 {offsets = [0, 0, 2, 0], sizes = [2, 8, 8, 8], strides = [1, 1, 1, 1]} : vector<2x10x10x8xf32> to vector<2x8x8x8xf32>
    %11 = vector.shape_cast %10 : vector<2x8x8x8xf32> to vector<128x8xf32>
    %c0_7 = arith.constant 0 : index
    %c16 = arith.constant 16 : index
    %12 = vector.load %arg7[%c0_7, %c16] : memref<128x72xf32, #tpu.memory_space<vmem>>, vector<128x8xf32>
    tpu.vector_store %arg7[%c0_7, %c16], %11 {strides = array<i32>} : memref<128x72xf32, #tpu.memory_space<vmem>>, vector<128x8xf32>,
    %13 = vector.extract_strided_slice %3 {offsets = [0, 1, 0, 0], sizes = [2, 8, 8, 8], strides = [1, 1, 1, 1]} : vector<2x10x10x8xf32> to vector<2x8x8x8xf32>
    %14 = vector.shape_cast %13 : vector<2x8x8x8xf32> to vector<128x8xf32>
    %c0_8 = arith.constant 0 : index
    %c24 = arith.constant 24 : index
    %15 = vector.load %arg7[%c0_8, %c24] : memref<128x72xf32, #tpu.memory_space<vmem>>, vector<128x8xf32>
    tpu.vector_store %arg7[%c0_8, %c24], %14 {strides = array<i32>} : memref<128x72xf32, #tpu.memory_space<vmem>>, vector<128x8xf32>,
    %16 = vector.extract_strided_slice %3 {offsets = [0, 1, 1, 0], sizes = [2, 8, 8, 8], strides = [1, 1, 1, 1]} : vector<2x10x10x8xf32> to vector<2x8x8x8xf32>
    %17 = vector.shape_cast %16 : vector<2x8x8x8xf32> to vector<128x8xf32>
    %c0_9 = arith.constant 0 : index
    %c32 = arith.constant 32 : index
    %18 = vector.load %arg7[%c0_9, %c32] : memref<128x72xf32, #tpu.memory_space<vmem>>, vector<128x8xf32>
    tpu.vector_store %arg7[%c0_9, %c32], %17 {strides = array<i32>} : memref<128x72xf32, #tpu.memory_space<vmem>>, vector<128x8xf32>,
    %19 = vector.extract_strided_slice %3 {offsets = [0, 1, 2, 0], sizes = [2, 8, 8, 8], strides = [1, 1, 1, 1]} : vector<2x10x10x8xf32> to vector<2x8x8x8xf32>
    %20 = vector.shape_cast %19 : vector<2x8x8x8xf32> to vector<128x8xf32>
    %c0_10 = arith.constant 0 : index
    %c40 = arith.constant 40 : index
    %21 = vector.load %arg7[%c0_10, %c40] : memref<128x72xf32, #tpu.memory_space<vmem>>, vector<128x8xf32>
    tpu.vector_store %arg7[%c0_10, %c40], %20 {strides = array<i32>} : memref<128x72xf32, #tpu.memory_space<vmem>>, vector<128x8xf32>,
    %22 = vector.extract_strided_slice %3 {offsets = [0, 2, 0, 0], sizes = [2, 8, 8, 8], strides = [1, 1, 1, 1]} : vector<2x10x10x8xf32> to vector<2x8x8x8xf32>
    %23 = vector.shape_cast %22 : vector<2x8x8x8xf32> to vector<128x8xf32>
    %c0_11 = arith.constant 0 : index
    %c48 = arith.constant 48 : index
    %24 = vector.load %arg7[%c0_11, %c48] : memref<128x72xf32, #tpu.memory_space<vmem>>, vector<128x8xf32>
    tpu.vector_store %arg7[%c0_11, %c48], %23 {strides = array<i32>} : memref<128x72xf32, #tpu.memory_space<vmem>>, vector<128x8xf32>,
    %25 = vector.extract_strided_slice %3 {offsets = [0, 2, 1, 0], sizes = [2, 8, 8, 8], strides = [1, 1, 1, 1]} : vector<2x10x10x8xf32> to vector<2x8x8x8xf32>
    %26 = vector.shape_cast %25 : vector<2x8x8x8xf32> to vector<128x8xf32>
    %c0_12 = arith.constant 0 : index
    %c56 = arith.constant 56 : index
    %27 = vector.load %arg7[%c0_12, %c56] : memref<128x72xf32, #tpu.memory_space<vmem>>, vector<128x8xf32>
    tpu.vector_store %arg7[%c0_12, %c56], %26 {strides = array<i32>} : memref<128x72xf32, #tpu.memory_space<vmem>>, vector<128x8xf32>,
    %28 = vector.extract_strided_slice %3 {offsets = [0, 2, 2, 0], sizes = [2, 8, 8, 8], strides = [1, 1, 1, 1]} : vector<2x10x10x8xf32> to vector<2x8x8x8xf32>
    %29 = vector.shape_cast %28 : vector<2x8x8x8xf32> to vector<128x8xf32>
    %c0_13 = arith.constant 0 : index
    %c64 = arith.constant 64 : index
    %30 = vector.load %arg7[%c0_13, %c64] : memref<128x72xf32, #tpu.memory_space<vmem>>, vector<128x8xf32>
    tpu.vector_store %arg7[%c0_13, %c64], %29 {strides = array<i32>} : memref<128x72xf32, #tpu.memory_space<vmem>>, vector<128x8xf32>,
    %c0_14 = arith.constant 0 : index
    %c0_15 = arith.constant 0 : index
    %c0_16 = arith.constant 0 : index
    %31 = vector.load %arg1[%c0_14, %c0_15, %c0_16] : memref<1x128x72xbf16, #tpu.memory_space<vmem>>, vector<1x128x72xbf16>
    %32 = vector.shape_cast %31 : vector<1x128x72xbf16> to vector<128x72xbf16>
    %c0_17 = arith.constant 0 : index
    %c0_18 = arith.constant 0 : index
    %33 = vector.load %arg2[%c0_17, %c0_18] : memref<72x32xbf16, #tpu.memory_space<vmem>>, vector<72x32xbf16>
    %cst = arith.constant dense<0.000000e+00> : vector<128x32xf32>
    %34 = tpu.matmul %32, %33, %cst {dimension_numbers = #tpu.dot_dimension_numbers<[1], [0], [0], [1], [0, 0, 1, 1], [], []>} : vector<128x72xbf16>, vector<72x32xbf16>, vector<128x32xf32> -> vector<128x32xf32>
    %c0_19 = arith.constant 0 : index
    %c0_20 = arith.constant 0 : index
    %35 = vector.load %arg7[%c0_19, %c0_20] : memref<128x72xf32, #tpu.memory_space<vmem>>, vector<128x72xf32>
    %36 = arith.truncf %35 : vector<128x72xf32> to vector<128x72xbf16>
    %c0_21 = arith.constant 0 : index
    %c0_22 = arith.constant 0 : index
    %37 = vector.load %arg3[%c0_21, %c0_22] : memref<72x32xbf16, #tpu.memory_space<vmem>>, vector<72x32xbf16>
    %cst_23 = arith.constant dense<0.000000e+00> : vector<128x32xf32>
    %38 = tpu.matmul %36, %37, %cst_23 {dimension_numbers = #tpu.dot_dimension_numbers<[1], [0], [0], [1], [0, 0, 1, 1], [], []>} : vector<128x72xbf16>, vector<72x32xbf16>, vector<128x32xf32> -> vector<128x32xf32>
    %39 = arith.addf %34, %38 : vector<128x32xf32>
    %c0_24 = arith.constant 0 : index
    %c0_25 = arith.constant 0 : index
    %40 = vector.load %arg4[%c0_24, %c0_25] : memref<1x32xf32, #tpu.memory_space<vmem>>, vector<1x32xf32>
    %41 = vector.broadcast %40 : vector<1x32xf32> to vector<128x32xf32>
    %42 = arith.addf %39, %41 : vector<128x32xf32>
    %43 = vector.extract_strided_slice %42 {offsets = [0, 0], sizes = [128, 24], strides = [1, 1]} : vector<128x32xf32> to vector<128x24xf32>
    %44 = arith.negf %43 : vector<128x24xf32>
    %45 = math.exp %44 : vector<128x24xf32>
    %cst_26 = arith.constant 1.000000e+00 : f32
    %46 = vector.broadcast %cst_26 : f32 to vector<128x24xf32>
    %47 = arith.addf %46, %45 : vector<128x24xf32>
    %48 = arith.divf %46, %47 : vector<128x24xf32>
    %49 = vector.extract_strided_slice %42 {offsets = [0, 24], sizes = [128, 8], strides = [1, 1]} : vector<128x32xf32> to vector<128x8xf32>
    %50 = math.tanh %49 : vector<128x8xf32>
    %51 = vector.extract_strided_slice %48 {offsets = [0, 0], sizes = [128, 8], strides = [1, 1]} : vector<128x24xf32> to vector<128x8xf32>
    %52 = vector.extract_strided_slice %48 {offsets = [0, 8], sizes = [128, 8], strides = [1, 1]} : vector<128x24xf32> to vector<128x8xf32>
    %53 = vector.extract_strided_slice %48 {offsets = [0, 16], sizes = [128, 8], strides = [1, 1]} : vector<128x24xf32> to vector<128x8xf32>
    %c0_27 = arith.constant 0 : index
    %c0_28 = arith.constant 0 : index
    %54 = vector.load %arg8[%c0_27, %c0_28] : memref<128x8xf32, #tpu.memory_space<vmem>>, vector<128x8xf32>
    %55 = arith.mulf %52, %54 : vector<128x8xf32>
    %56 = arith.mulf %51, %50 : vector<128x8xf32>
    %57 = arith.addf %55, %56 : vector<128x8xf32>
    %58 = math.tanh %57 : vector<128x8xf32>
    %59 = arith.mulf %53, %58 : vector<128x8xf32>
    %c0_29 = arith.constant 0 : index
    %c0_30 = arith.constant 0 : index
    %60 = vector.load %arg8[%c0_29, %c0_30] : memref<128x8xf32, #tpu.memory_space<vmem>>, vector<128x8xf32>
    tpu.vector_store %arg8[%c0_29, %c0_30], %57 {strides = array<i32>} : memref<128x8xf32, #tpu.memory_space<vmem>>, vector<128x8xf32>,
    %61 = vector.shape_cast %59 : vector<128x8xf32> to vector<2x8x8x8xf32>
    %c0_31 = arith.constant 0 : index
    %c1 = arith.constant 1 : index
    %c1_32 = arith.constant 1 : index
    %c0_33 = arith.constant 0 : index
    %62 = vector.load %arg6[%c0_31, %c1, %c1_32, %c0_33] : memref<2x10x10x8xf32, #tpu.memory_space<vmem>>, vector<2x8x8x8xf32>
    tpu.vector_store %arg6[%c0_31, %c1, %c1_32, %c0_33], %61 {strides = array<i32>} : memref<2x10x10x8xf32, #tpu.memory_space<vmem>>, vector<2x8x8x8xf32>,
    %c2_i32 = arith.constant 2 : i32
    %63 = arith.cmpi eq, %arg0, %c2_i32 : i32
    %64 = arith.extui %63 : i1 to i32
    %c0_i32_34 = arith.constant 0 : i32
    %65 = arith.cmpi ne, %64, %c0_i32_34 : i32
    scf.if %65 {
      %c0_35 = arith.constant 0 : index
      %c0_36 = arith.constant 0 : index
      %66 = vector.load %arg5[%c0_35, %c0_36] : memref<128x8xf32, #tpu.memory_space<vmem>>, vector<128x8xf32>
      tpu.vector_store %arg5[%c0_35, %c0_36], %59 {strides = array<i32>} : memref<128x8xf32, #tpu.memory_space<vmem>>, vector<128x8xf32>,
    } else {
    }
    return
  }
  func.func @transform_0(%arg0: i32) -> (i32, i32, i32) {
    %c0_i32 = arith.constant 0 : i32
    %c0_i32_0 = arith.constant 0 : i32
    %c0_i32_1 = arith.constant 0 : i32
    return %arg0, %c0_i32, %c0_i32_0 : i32, i32, i32
  }
  func.func @transform_1(%arg0: i32) -> (i32, i32) {
    %c0_i32 = arith.constant 0 : i32
    %c0_i32_0 = arith.constant 0 : i32
    %c0_i32_1 = arith.constant 0 : i32
    return %c0_i32, %c0_i32_0 : i32, i32
  }
  func.func @transform_2(%arg0: i32) -> (i32, i32) {
    %c0_i32 = arith.constant 0 : i32
    %c0_i32_0 = arith.constant 0 : i32
    %c0_i32_1 = arith.constant 0 : i32
    return %c0_i32, %c0_i32_0 : i32, i32
  }
  func.func @transform_3(%arg0: i32) -> (i32, i32) {
    %c0_i32 = arith.constant 0 : i32
    %c0_i32_0 = arith.constant 0 : i32
    %c0_i32_1 = arith.constant 0 : i32
    return %c0_i32, %c0_i32_0 : i32, i32
  }
  func.func @transform_4(%arg0: i32) -> (i32, i32) {
    %c0_i32 = arith.constant 0 : i32
    %c0_i32_0 = arith.constant 0 : i32
    %c0_i32_1 = arith.constant 0 : i32
    return %c0_i32, %c0_i32_0 : i32, i32
  }
}

</mosaic_0001>

<bundles_post_ra>
// kernel: conv_lstm_sequence.1
= control target key start
LH: loop header
LB: loop body
LE: loop exit
PB: predicated region body
PF: predicated region fallthrough
CT: control target
= control target key end

     0   :  { %s2436_s15 = smov 0   ;;  %s3480_s0 = inlined_call_operand.vmem [shape: bf16[3,128,72], index: 0, kind: input, shape index: {}]   ;;  %s3481_s1 = inlined_call_operand.vmem [shape: bf16[72,32], index: 1, kind: input, shape index: {}]   ;;  %s3482_s2 = inlined_call_operand.vmem [shape: bf16[72,32], index: 2, kind: input, shape index: {}]   ;;  %s3483_s3 = inlined_call_operand.vmem [shape: f32[1,32], index: 3, kind: input, shape index: {}]   ;;  %s3484_s4 = inlined_call_operand.vmem [shape: f32[128,8], index: 4, kind: output, shape index: {}]  }
   0x1 LB: > { %s2442_s16 = sadd.s32 4294967295, %s2397_s15   ;;  %p2086_p0 = scmp.ge.s32.totalorder %s2397_s15, 1  ;;  %s2397_s15 = sphi %s2436_s15, %s14_s15  }
   0x2   : > { %p157_p1 = scmp.lt.s32.totalorder %s2397_s15, 4 }
   0x4   : > { %p158_p2 = pnand %p2086_p0, %p157_p1 }
   0x5   : > { %p178_p3 = scmp.lt.s32.totalorder (!%p158_p2), %s2442_s16, 2  ;;  %p2089_p4 = scmp.ne.s32.totalorder (!%p158_p2), %s2442_s16, 0 }
   0x6   : > { %161 = sbr.rel (%p158_p2) target bundleno = 1148 (0x47c), region = 36 }
   0xb   : > { %s179_s17 = scalar_select %p178_p3, %s2442_s16, 2 }
   0xc   : > { %187 = sbr.rel (%p2089_p4) target bundleno = 46 (0x2e), region = 40 }
   0xd   : > { %s2144_s18 = sshll.u32 %s179_s17, 6 }
   0xe   : > { %s2451_s21 = scalar_lea.vmem %s3480_s0, %s2144_s18 }
  0x11   : > { %vm188_vm0 = vcmask 64512   ;;  %vm190_vm1 = vcmask 58368   ;;  %v2399_v0 = vmov 0.0  }
  0x12   : > { %189 = vst.msk [vmem:[#allocation2] sm:$0xff] %vm188_vm0, %v2399_v0  ;;  %192 = vst.msk [vmem:[#allocation2 + $0x10] sm:$0xff] %vm188_vm0, %v2399_v0 }
  0x13   : > { %194 = vst.msk [vmem:[#allocation2 + $0x20] sm:$0xff] %vm188_vm0, %v2399_v0  ;;  %196 = vst.msk [vmem:[#allocation2 + $0x30] sm:$0xff] %vm188_vm0, %v2399_v0 }
  0x14   : > { %198 = vst.msk [vmem:[#allocation2 + $0x40] sm:$0xff] %vm188_vm0, %v2399_v0  ;;  %200 = vst.msk [vmem:[#allocation2 + $0x50] sm:$0xff] %vm188_vm0, %v2399_v0 }
  0x15   : > { %202 = vst.msk [vmem:[#allocation2 + $0x60] sm:$0xff] %vm188_vm0, %v2399_v0  ;;  %204 = vst.msk [vmem:[#allocation2 + $0x70] sm:$0xff] %vm188_vm0, %v2399_v0 }
  0x16   : > { %206 = vst.msk [vmem:[#allocation2 + $0x80] sm:$0xff] %vm188_vm0, %v2399_v0  ;;  %208 = vst.msk [vmem:[#allocation2 + $0x90] sm:$0xff] %vm188_vm0, %v2399_v0 }
  0x17   : > { %210 = vst.msk [vmem:[#allocation2 + $0xa0] sm:$0xff] %vm188_vm0, %v2399_v0  ;;  %212 = vst.msk [vmem:[#allocation2 + $0xb0] sm:$0xff] %vm188_vm0, %v2399_v0 }
  0x18   : > { %214 = vst.msk [vmem:[#allocation2 + $0xc0] sm:$0xff] %vm188_vm0, %v2399_v0  ;;  %216 = vst.msk [vmem:[#allocation2 + $0xd0] sm:$0xff] %vm188_vm0, %v2399_v0 }
  0x19   : > { %218 = vst.msk [vmem:[#allocation2 + $0xe0] sm:$0xff] %vm188_vm0, %v2399_v0  ;;  %220 = vst.msk [vmem:[#allocation2 + $0xf0] sm:$0xff] %vm188_vm0, %v2399_v0 }
  0x1a   : > { %222 = vst.msk [vmem:[#allocation2 + $0x100] sm:$0xff] %vm188_vm0, %v2399_v0  ;;  %224 = vst.msk [vmem:[#allocation2 + $0x110] sm:$0xff] %vm188_vm0, %v2399_v0 }
  0x1b   : > { %226 = vst.msk [vmem:[#allocation2 + $0x120] sm:$0xff] %vm188_vm0, %v2399_v0  ;;  %228 = vst.msk [vmem:[#allocation2 + $0x130] sm:$0xff] %vm188_vm0, %v2399_v0 }
  0x1c   : > { %230 = vst.msk [vmem:[#allocation4] sm:$0xff] %vm188_vm0, %v2399_v0  ;;  %231 = vst.msk [vmem:[#allocation4 + $0x8] sm:$0xff] %vm188_vm0, %v2399_v0 }
  0x1d   : > { %232 = vst.msk [vmem:[#allocation4 + $0x10] sm:$0xff] %vm188_vm0, %v2399_v0  ;;  %233 = vst.msk [vmem:[#allocation4 + $0x18] sm:$0xff] %vm188_vm0, %v2399_v0 }
  0x1e   : > { %234 = vst.msk [vmem:[#allocation4 + $0x20] sm:$0xff] %vm188_vm0, %v2399_v0  ;;  %235 = vst.msk [vmem:[#allocation4 + $0x28] sm:$0xff] %vm188_vm0, %v2399_v0 }
  0x1f   : > { %236 = vst.msk [vmem:[#allocation4 + $0x30] sm:$0xff] %vm188_vm0, %v2399_v0  ;;  %237 = vst.msk [vmem:[#allocation4 + $0x38] sm:$0xff] %vm188_vm0, %v2399_v0 }
  0x20   : > { %238 = vst.msk [vmem:[#allocation4 + $0x40] sm:$0xff] %vm188_vm0, %v2399_v0  ;;  %239 = vst.msk [vmem:[#allocation4 + $0x48] sm:$0xff] %vm188_vm0, %v2399_v0 }
  0x21   : > { %240 = vst.msk [vmem:[#allocation4 + $0x50] sm:$0xff] %vm188_vm0, %v2399_v0  ;;  %241 = vst.msk [vmem:[#allocation4 + $0x58] sm:$0xff] %vm188_vm0, %v2399_v0 }
  0x22   : > { %242 = vst.msk [vmem:[#allocation4 + $0x60] sm:$0xff] %vm188_vm0, %v2399_v0  ;;  %243 = vst.msk [vmem:[#allocation4 + $0x68] sm:$0xff] %vm188_vm0, %v2399_v0 }
  0x23   : > { %244 = vst.msk [vmem:[#allocation4 + $0x70] sm:$0xff] %vm188_vm0, %v2399_v0  ;;  %245 = vst.msk [vmem:[#allocation4 + $0x78] sm:$0xff] %vm188_vm0, %v2399_v0 }
  0x24   : > { %191 = vst.msk [vmem:[#allocation2 + $0x8] sm:$0x3] %vm190_vm1, %v2399_v0  ;;  %193 = vst.msk [vmem:[#allocation2 + $0x18] sm:$0x3] %vm190_vm1, %v2399_v0 }
  0x25   : > { %195 = vst.msk [vmem:[#allocation2 + $0x28] sm:$0x3] %vm190_vm1, %v2399_v0  ;;  %197 = vst.msk [vmem:[#allocation2 + $0x38] sm:$0x3] %vm190_vm1, %v2399_v0 }
  0x26   : > { %199 = vst.msk [vmem:[#allocation2 + $0x48] sm:$0x3] %vm190_vm1, %v2399_v0  ;;  %201 = vst.msk [vmem:[#allocation2 + $0x58] sm:$0x3] %vm190_vm1, %v2399_v0 }
  0x27   : > { %203 = vst.msk [vmem:[#allocation2 + $0x68] sm:$0x3] %vm190_vm1, %v2399_v0  ;;  %205 = vst.msk [vmem:[#allocation2 + $0x78] sm:$0x3] %vm190_vm1, %v2399_v0 }
  0x28   : > { %207 = vst.msk [vmem:[#allocation2 + $0x88] sm:$0x3] %vm190_vm1, %v2399_v0  ;;  %209 = vst.msk [vmem:[#allocation2 + $0x98] sm:$0x3] %vm190_vm1, %v2399_v0 }
  0x29   : > { %211 = vst.msk [vmem:[#allocation2 + $0xa8] sm:$0x3] %vm190_vm1, %v2399_v0  ;;  %213 = vst.msk [vmem:[#allocation2 + $0xb8] sm:$0x3] %vm190_vm1, %v2399_v0 }
  0x2a   : > { %215 = vst.msk [vmem:[#allocation2 + $0xc8] sm:$0x3] %vm190_vm1, %v2399_v0  ;;  %217 = vst.msk [vmem:[#allocation2 + $0xd8] sm:$0x3] %vm190_vm1, %v2399_v0 }
  0x2b   : > { %219 = vst.msk [vmem:[#allocation2 + $0xe8] sm:$0x3] %vm190_vm1, %v2399_v0  ;;  %221 = vst.msk [vmem:[#allocation2 + $0xf8] sm:$0x3] %vm190_vm1, %v2399_v0 }
  0x2c   : > { %223 = vst.msk [vmem:[#allocation2 + $0x108] sm:$0x3] %vm190_vm1, %v2399_v0  ;;  %225 = vst.msk [vmem:[#allocation2 + $0x118] sm:$0x3] %vm190_vm1, %v2399_v0 }
  0x2d   : > { %227 = vst.msk [vmem:[#allocation2 + $0x128] sm:$0x3] %vm190_vm1, %v2399_v0  ;;  %229 = vst.msk [vmem:[#allocation2 + $0x138] sm:$0x3] %vm190_vm1, %v2399_v0 }
  0x2e PF: > { %v2510_v1 = vld [vmem:[#allocation2 + $0x20] sm:$0xff]  ;;  %v251_v2 = vld [vmem:[#allocation2 + $0x28] sm:$0x3]  ;;  %vm335_vm2 = vcmask 1046528   ;;  %v2513_v8 = vld [vmem:[#allocation2 + $0x30] sm:$0xff]  ;;  %s2400_s22 = smov 8  }
  0x2f   : > { %v246_v3 = vld [vmem:[#allocation2] sm:$0xff]  ;;  %v342_v4 = vrot.slane %v2510_v1, 1  ;;  %v343_v5 = vrot.slane %v251_v2, 1  ;;  %v247_v6 = vld [vmem:[#allocation2 + $0x8] sm:$0x3]  ;;  %v345_v11 = vrot.slane %v2513_v8, 1 }
  0x30   : > { %v336_v7 = vrot.slane %v246_v3, 1  ;;  %v337_v9 = vrot.slane %v247_v6, 1  ;;  %v253_v10 = vld [vmem:[#allocation2 + $0x38] sm:$0x3]  ;;  %v248_v12 = vld [vmem:[#allocation2 + $0x10] sm:$0xff]  ;;  %vm449_vm3 = vcmask 1045504  }
  0x31   : > { %v2517_v13 = vsel %vm335_vm2, %v342_v4, %v343_v5  ;;  %v346_v14 = vrot.slane %v253_v10, 1  ;;  %v249_v15 = vld [vmem:[#allocation2 + $0x18] sm:$0x3]  ;;  %v339_v16 = vrot.slane %v248_v12, 1  ;;  %v453_v20 = vrot.slane %v248_v12, 2  ;;  %s2401_s23 = smov 16  }
  0x32   : > { %388 = vrot.lane.b32.xlu1 %v2517_v13, %s2400_s22  ;;  %v338_v17 = vsel %vm335_vm2, %v336_v7, %v337_v9  ;;  %v340_v18 = vrot.slane %v249_v15, 1  ;;  %v454_v21 = vrot.slane %v249_v15, 2  ;;  %v450_v23 = vrot.slane %v246_v3, 2  ;;  %v2539_v32 = vld [vmem:[#allocation2 + $0x40] sm:$0xff]  ;;  %v2541_v33 = vld [vmem:[#allocation2 + $0x50] sm:$0xff]  ;;  %s2402_s24 = smov 24  }
  0x33   : > { %384 = vrot.lane.b32.xlu0 %v338_v17, %s2400_s22  ;;  %v2524_v19 = vsel %vm335_vm2, %v345_v11, %v346_v14  ;;  %v451_v24 = vrot.slane %v247_v6, 2  ;;  %v459_v26 = vrot.slane %v2513_v8, 2  ;;  %v460_v27 = vrot.slane %v253_v10, 2  ;;  %v2543_v34 = vld [vmem:[#allocation2 + $0x70] sm:$0xff]  ;;  %v2548_v36 = vld [vmem:[#allocation2 + $0x60] sm:$0xff]  ;;  %s2403_s25 = smov 32  }
  0x34   : > { %v341_v22 = vsel %vm335_vm2, %v339_v16, %v340_v18  ;;  %v455_v25 = vsel %vm449_vm3, %v453_v20, %v454_v21  ;;  %v456_v29 = vrot.slane %v2510_v1, 2  ;;  %v457_v30 = vrot.slane %v251_v2, 2  ;;  %v2550_v37 = vld [vmem:[#allocation2 + $0xb0] sm:$0xff]  ;;  %v2552_v38 = vld [vmem:[#allocation2 + $0xa0] sm:$0xff]  ;;  %v255_v41 = vld [vmem:[#allocation2 + $0x48] sm:$0x3] }
  0x35   : > { %v452_v28 = vsel %vm449_vm3, %v450_v23, %v451_v24  ;;  %v2537_v31 = vsel %vm449_vm3, %v459_v26, %v460_v27  ;;  %vm286_vm4 = vcmask 64512   ;;  %v2554_v39 = vld [vmem:[#allocation2 + $0xd0] sm:$0xff]  ;;  %v2556_v40 = vld [vmem:[#allocation2 + $0xc0] sm:$0xff]  ;;  %v348_v42 = vrot.slane %v2539_v32, 1  ;;  %s2404_s26 = smov 40   ;;  %s2405_s27 = smov 48  }
  0x36   : > { %390 = vrot.lane.b32.xlu1 %v2524_v19, %s2400_s22  ;;  %v2546_v35 = vsel %vm449_vm3, %v456_v29, %v457_v30  ;;  %289 = vst.msk [vmem:[#allocation3 + $0x10] sm:$0xff] %vm286_vm4, %v2510_v1  ;;  %287 = vst.msk [vmem:[#allocation3] sm:$0xff] %vm286_vm4, %v246_v3  ;;  %v349_v43 = vrot.slane %v255_v41, 1  ;;  %v2590_v44 = vld [vmem:[#allocation2 + $0xe0] sm:$0xff]  ;;  %v462_v46 = vrot.slane %v2539_v32, 2  ;;  %v463_v47 = vrot.slane %v255_v41, 2 }
  0x37   : > { %386 = vrot.lane.b32.xlu0 %v341_v22, %s2400_s22  ;;  %288 = vst.msk [vmem:[#allocation3 + $0x8] sm:$0xff] %vm286_vm4, %v248_v12  ;;  %290 = vst.msk [vmem:[#allocation3 + $0x18] sm:$0xff] %vm286_vm4, %v2513_v8  ;;  %v2245_v49 = vld [vmem:[%s3482_s2 + $0x20] ss:$0 sps:$4 sm:$0xff]   ;;  %vm1095_vm5 = vcmask 1043456   ;;  %v2629_v54 = vld [vmem:[#allocation2 + $0xf0] sm:$0xff] }
  0x38   : > { %291 = vst.msk [vmem:[#allocation3 + $0x20] sm:$0xff] %vm286_vm4, %v2539_v32  ;;  %292 = vst.msk [vmem:[#allocation3 + $0x28] sm:$0xff] %vm286_vm4, %v2541_v33  ;;  %v2600_v45 = vsel %vm335_vm2, %v348_v42, %v349_v43  ;;  %v2611_v48 = vsel %vm449_vm3, %v462_v46, %v463_v47  ;;  %v2246_v50 = vld [vmem:[%s3481_s1 + $0x20] ss:$0 sps:$4 sm:$0xff]   ;;  %v257_v51 = vld [vmem:[#allocation2 + $0x58] sm:$0x3]  ;;  %2223 = vmatprep.subr.msk.bf16.mxu0 %vm1095_vm5, %v2245_v49 }
  0x39   : > { %293 = vst.msk [vmem:[#allocation3 + $0x30] sm:$0xff] %vm286_vm4, %v2548_v36  ;;  %294 = vst.msk [vmem:[#allocation3 + $0x38] sm:$0xff] %vm286_vm4, %v2543_v34  ;;  %2224 = vmatprep.subr.msk.bf16.mxu1 %vm1095_vm5, %v2246_v50  ;;  %v1097_v52 = vsel %vm1095_vm5, %v2245_v49, 0  ;;  %v1288_v53 = vsel %vm1095_vm5, %v2246_v50, 0  ;;  %v2247_v55 = vld [vmem:[%s3482_s2 + $0x18] sm:$0xff]   ;;  %v351_v57 = vrot.slane %v2541_v33, 1 }
  0x3a   : > { %500 = vrot.lane.b32.xlu1 %v455_v25, %s2401_s23  ;;  %296 = vst.msk [vmem:[#allocation3 + $0x48] sm:$0xff] %vm286_vm4, %v2550_v37  ;;  %295 = vst.msk [vmem:[#allocation3 + $0x40] sm:$0xff] %vm286_vm4, %v2552_v38  ;;  %2172 = vmatpush3.bf16.msra.mxu0 %v1097_v52  ;;  %v2248_v56 = vld [vmem:[%s3481_s1 + $0x18] sm:$0xff]   ;;  %v352_v58 = vrot.slane %v257_v51, 1  ;;  %s2406_s10 = smov 56   ;;  %v2249_v59 = vld [vmem:[%s3482_s2 + $0x10] sm:$0xff]  }
  0x3b   : > { %498 = vrot.lane.b32.xlu0 %v452_v28, %s2401_s23  ;;  %298 = vst.msk [vmem:[#allocation3 + $0x58] sm:$0xff] %vm286_vm4, %v2554_v39  ;;  %297 = vst.msk [vmem:[#allocation3 + $0x50] sm:$0xff] %vm286_vm4, %v2556_v40  ;;  %2198 = vmatpush3.bf16.msra.mxu1 %v1288_v53  ;;  %v2250_v60 = vld [vmem:[%s3481_s1 + $0x10] sm:$0xff]   ;;  %v2251_v62 = vld [vmem:[%s3482_s2 + $0x8] sm:$0xff]   ;;  %s2407_s28 = smov 64   ;;  %v465_v2 = vrot.slane %v2541_v33, 2 }
  0x3c   : > { %299 = vst.msk [vmem:[#allocation3 + $0x60] sm:$0xff] %vm286_vm4, %v2590_v44  ;;  %300 = vst.msk [vmem:[#allocation3 + $0x68] sm:$0xff] %vm286_vm4, %v2629_v54  ;;  %2173 = vmatprep.subr.bf16.mxu0 %v2247_v55  ;;  %2199 = vmatprep.subr.bf16.mxu1 %v2248_v56  ;;  %v2653_v61 = vsel %vm335_vm2, %v351_v57, %v352_v58  ;;  %v2252_v63 = vld [vmem:[%s3481_s1 + $0x8] sm:$0xff]   ;;  %v2253_v0 = vld [vmem:[%s3482_s2] sm:$0xff]   ;;  %v466_v3 = vrot.slane %v257_v51, 2  ;;  %vm1070_vm6 = vcmask 588800  }
  0x3d   : > { %v261_v4 = vld [vmem:[#allocation2 + $0x78] sm:$0x3]  ;;  %v259_v5 = vld [vmem:[#allocation2 + $0x68] sm:$0x3]  ;;  %v2255_v6 = vld [vmem:[%s2451_s21] sm:$0xff]   ;;  %v357_v9 = vrot.slane %v2543_v34, 1 }
  0x3e   : > { %504 = vrot.lane.b32.xlu1 %v2537_v31, %s2401_s23  ;;  %2174 = vmatpush3.bf16.msra.mxu0 %v2247_v55  ;;  %v2256_v7 = vld [vmem:[%s2451_s21 + $0x8] sm:$0xff]   ;;  %v358_v10 = vrot.slane %v261_v4, 1  ;;  %v354_v11 = vrot.slane %v2548_v36, 1  ;;  %v2691_v14 = vld [vmem:[#allocation2 + $0x110] sm:$0xff]  ;;  %v2693_v15 = vld [vmem:[#allocation2 + $0x100] sm:$0xff]  ;;  %v471_v17 = vrot.slane %v2543_v34, 2 }
  0x3f   : > { %502 = vrot.lane.b32.xlu0 %v2546_v35, %s2401_s23  ;;  %2200 = vmatpush3.bf16.msra.mxu1 %v2248_v56  ;;  %302 = vst.msk [vmem:[#allocation3 + $0x78] sm:$0xff] %vm286_vm4, %v2691_v14  ;;  %301 = vst.msk [vmem:[#allocation3 + $0x70] sm:$0xff] %vm286_vm4, %v2693_v15  ;;  %v472_v18 = vrot.slane %v261_v4, 2  ;;  %v469_v20 = vrot.slane %v259_v5, 2  ;;  %v262_v23 = vld [vmem:[#allocation2 + $0x80] sm:$0xff]  ;;  %vm432_vm7 = vcmask 130112  }
  0x40   : > { %2175 = vmatprep.subr.bf16.mxu0 %v2249_v59  ;;  %2201 = vmatprep.subr.bf16.mxu1 %v2250_v60  ;;  %v263_v24 = vld [vmem:[#allocation2 + $0x88] sm:$0x3]  ;;  %v703_v28 = vrot.slane %v262_v23, 2  ;;  %vm546_vm8 = vcmask 195712   ;;  %v273_v57 = vld [vmem:[#allocation2 + $0xd8] sm:$0x3] }
  0x41   : > { %2207 = vmatprep.mubr.msk.bf16.mxu1 %vm1070_vm6, %v2255_v6  ;;  %v473_v21 = vsel %vm449_vm3, %v471_v17, %v472_v18  ;;  %v633_v26 = vrot.slane %v263_v24, 1  ;;  %v704_v29 = vrot.slane %v263_v24, 2  ;;  %v267_v43 = vld [vmem:[#allocation2 + $0xa8] sm:$0x3]  ;;  %vm613_vm9 = vcmask 261312   ;;  %p2141_p5 = scmp.ne.s32.totalorder %s2442_s16, 2 }
  0x42   : > { %567 = vrot.lane.b32.xlu1 %v2510_v1, %s2402_s24  ;;  %2176 = vmatpush3.bf16.msra.mxu0 %v2249_v59  ;;  %v361_v49 = vrot.slane %v267_v43, 1  ;;  %v271_v59 = vld [vmem:[#allocation2 + $0xc8] sm:$0x3]  ;;  %v477_v6 = vrot.slane %v2550_v37, 2  ;;  %v484_v17 = vrot.slane %v273_v57, 2  ;;  %vm686_vm10 = vcmask 326912  }
  0x43   : > { %565 = vrot.lane.b32.xlu0 %v248_v12, %s2402_s24  ;;  %2202 = vmatpush3.bf16.msra.mxu1 %v2250_v60  ;;  %v355_v12 = vrot.slane %v259_v5, 1  ;;  %v705_v30 = vsel %vm449_vm3, %v703_v28, %v704_v29  ;;  %v2257_v60 = vld [vmem:[%s2451_s21 + $0x10] sm:$0xff]   ;;  %vm757_vm11 = vcmask 392512   ;;  %v275_v29 = vld [vmem:[#allocation2 + $0xe8] sm:$0x3]  ;;  %vm824_vm12 = vcmask 458112  }
  0x44   : > { %2177 = vmatprep.subr.bf16.mxu0 %v2251_v62  ;;  %2203 = vmatprep.subr.bf16.mxu1 %v2252_v63  ;;  %vm897_vm13 = vcmask 523712   ;;  %vm968_vm14 = vcmask 589312  }
  0x45   : > { %v356_v16 = vsel %vm335_vm2, %v354_v11, %v355_v12  ;;  %v475_v11 = vrot.slane %v267_v43, 2 }
  0x46   : > { %571 = vrot.lane.b32.xlu1 %v2539_v32, %s2402_s24  ;;  %2178 = vmatpush3.bf16.msra.mxu0 %v2251_v62 }
  0x47   : > { %569 = vrot.lane.b32.xlu0 %v2513_v8, %s2402_s24  ;;  %2204 = vmatpush3.bf16.msra.mxu1 %v2252_v63  ;;  %v369_v63 = vrot.slane %v2554_v39, 1 }
  0x48   : > { %2179 = vmatprep.subr.bf16.mxu0 %v2253_v0 }
  0x4a   : > { %640 = vrot.lane.b32.xlu1 %v2517_v13, %s2403_s25  ;;  %2180 = vmatpush3.bf16.msra.mxu0 %v2253_v0  ;;  %v370_v0 = vrot.slane %v273_v57, 1 }
  0x4b   : > { %638 = vrot.lane.b32.xlu0 %v341_v22, %s2403_s25 }
  0x4c   : > { %v2769_v5 = vsel %vm335_vm2, %v369_v63, %v370_v0  ;;  %v489_v0 = vrot.slane %v2629_v54, 2 }
  0x4e   : > { %644 = vrot.lane.b32.xlu1 %v2600_v45, %s2403_s25 }
  0x4f   : > { %642 = vrot.lane.b32.xlu0 %v2524_v19, %s2403_s25 }
  0x52   : > { %711 = vrot.lane.b32.xlu1 %v2546_v35, %s2404_s26 }
  0x53   : > { %709 = vrot.lane.b32.xlu0 %v455_v25, %s2404_s26  ;;  %v632_v25 = vrot.slane %v262_v23, 1 }
  0x55   : > { %v634_v27 = vsel %vm335_vm2, %v632_v25, %v633_v26 }
  0x56   : > { %715 = vrot.lane.b32.xlu1 %v2611_v48, %s2404_s26 }
  0x57   : > { %713 = vrot.lane.b32.xlu0 %v2537_v31, %s2404_s26 }
  0x5a   : > { %778 = vrot.lane.b32.xlu1 %v2513_v8, %s2405_s27  ;;  %v467_v8 = vsel %vm449_vm3, %v465_v2, %v466_v3  ;;  %v366_v2 = vrot.slane %v2556_v40, 1  ;;  %v367_v3 = vrot.slane %v271_v59, 1 }
  0x5b   : > { %776 = vrot.lane.b32.xlu0 %v2510_v1, %s2405_s27  ;;  %v2254_v1 = vld [vmem:[%s3481_s1] sm:$0xff]  }
  0x5c   : > { %2205 = vmatprep.subr.bf16.mxu1 %v2254_v1 }
  0x5d   : > { %2206 = vmatpush3.bf16.msra.mxu1 %v2254_v1 }
  0x5e   : > { %782 = vrot.lane.b32.xlu1 %v2541_v33, %s2405_s27 }
  0x5f   : > { %780 = vrot.lane.b32.xlu0 %v2539_v32, %s2405_s27  ;;  %v265_v32 = vld [vmem:[#allocation2 + $0x98] sm:$0x3] }
  0x60   : > { %2208 = vmatmul.mubr.msk.bf16.vlgmr.msra.gmra.mxu1 %vm1070_vm6, %v2256_v7  ;;  %v915_v53 = vrot.slane %v265_v32, 2 }
  0x61   : > { %2211 = vmatprep.mubr.msk.bf16.mxu1 %vm1070_vm6, %v2257_v60 }
  0x62   : > { %851 = vrot.lane.b32.xlu1 %v2524_v19, %s2406_s10  ;;  %v468_v19 = vrot.slane %v2548_v36, 2 }
  0x63   : > { %849 = vrot.lane.b32.xlu0 %v2517_v13, %s2406_s10  ;;  %v359_v13 = vsel %vm335_vm2, %v357_v9, %v358_v10  ;;  %v2773_v9 = vsel %vm335_vm2, %v366_v2, %v367_v3  ;;  %v474_v10 = vrot.slane %v2552_v38, 2 }
  0x64   : > { %v470_v22 = vsel %vm449_vm3, %v468_v19, %v469_v20  ;;  %v480_v19 = vrot.slane %v2556_v40, 2  ;;  %v481_v20 = vrot.slane %v271_v59, 2 }
  0x66   : > { %855 = vrot.lane.b32.xlu1 %v2653_v61, %s2406_s10  ;;  %v2794_v24 = vsel %vm449_vm3, %v480_v19, %v481_v20 }
  0x67   : > { %853 = vrot.lane.b32.xlu0 %v2600_v45, %s2406_s10 }
  0x6a   : > { %922 = vrot.lane.b32.xlu1 %v2537_v31, %s2407_s28  ;;  %v264_v31 = vld [vmem:[#allocation2 + $0x90] sm:$0xff] }
  0x6b   : > { %920 = vrot.lane.b32.xlu0 %v2546_v35, %s2407_s28  ;;  %v844_v35 = vrot.slane %v265_v32, 1  ;;  %v914_v51 = vrot.slane %v264_v31, 2  ;;  %v373_v32 = vrot.slane %v275_v29, 1 }
  0x6d   : > { %v916_v62 = vsel %vm449_vm3, %v914_v51, %v915_v53 }
  0x6e   : > { %394 = vrot.lane.b32.xlu1 %v2653_v61, %s2400_s22 }
  0x6f   : > { %392 = vrot.lane.b32.xlu0 %v2600_v45, %s2400_s22  ;;  %v363_v45 = vrot.slane %v2550_v37, 1 }
  0x72   : > { %926 = vrot.lane.b32.xlu1 %v467_v8, %s2407_s28 }
  0x73   : > { %924 = vrot.lane.b32.xlu0 %v2611_v48, %s2407_s28 }
  0x76   : > { %398 = vrot.lane.b32.xlu1 %v359_v13, %s2400_s22 }
  0x77   : > { %396 = vrot.lane.b32.xlu0 %v356_v16, %s2400_s22 }
  0x7a   : > { %508 = vrot.lane.b32.xlu1 %v467_v8, %s2401_s23 }
  0x7b   : > { %506 = vrot.lane.b32.xlu0 %v2611_v48, %s2401_s23  ;;  %v360_v48 = vrot.slane %v2552_v38, 1  ;;  %v476_v38 = vsel %vm449_vm3, %v474_v10, %v475_v11  ;;  %v2260_v10 = vld [vmem:[%s2451_s21 + $0x28] sm:$0xff]  }
  0x7d   : > { %v362_v56 = vsel %vm335_vm2, %v360_v48, %v361_v49 }
  0x7e   : > { %512 = vrot.lane.b32.xlu1 %v473_v21, %s2401_s23 }
  0x7f   : > { %510 = vrot.lane.b32.xlu0 %v470_v22, %s2401_s23 }
  0x82   : > { %575 = vrot.lane.b32.xlu1 %v2548_v36, %s2402_s24 }
  0x83   : > { %573 = vrot.lane.b32.xlu0 %v2541_v33, %s2402_s24  ;;  %v843_v33 = vrot.slane %v264_v31, 1 }
  0x85   : > { %v845_v41 = vsel %vm335_vm2, %v843_v33, %v844_v35 }
  0x86   : > { %579 = vrot.lane.b32.xlu1 %v262_v23, %s2402_s24 }
  0x87   : > { %577 = vrot.lane.b32.xlu0 %v2543_v34, %s2402_s24 }
  0x8a   : > { %648 = vrot.lane.b32.xlu1 %v356_v16, %s2403_s25 }
  0x8b   : > { %646 = vrot.lane.b32.xlu0 %v2653_v61, %s2403_s25  ;;  %v2258_v61 = vld [vmem:[%s2451_s21 + $0x18] sm:$0xff]  }
  0x8c   : > { %2212 = vmatmul.mubr.msk.bf16.gmra.mxu1 %vm1070_vm6, %v2258_v61 }
  0x8e   : > { %652 = vrot.lane.b32.xlu1 %v634_v27, %s2403_s25 }
  0x8f   : > { %650 = vrot.lane.b32.xlu0 %v359_v13, %s2403_s25 }
  0x92   : > { %719 = vrot.lane.b32.xlu1 %v470_v22, %s2404_s26 }
  0x93   : > { %717 = vrot.lane.b32.xlu0 %v467_v8, %s2404_s26 }
  0x96   : > { %723 = vrot.lane.b32.xlu1 %v705_v30, %s2404_s26 }
  0x97   : > { %721 = vrot.lane.b32.xlu0 %v473_v21, %s2404_s26 }
  0x9a   : > { %786 = vrot.lane.b32.xlu1 %v2543_v34, %s2405_s27  ;;  %v269_v34 = vld [vmem:[#allocation2 + $0xb8] sm:$0x3] }
  0x9b   : > { %784 = vrot.lane.b32.xlu0 %v2548_v36, %s2405_s27  ;;  %v364_v46 = vrot.slane %v269_v34, 1  ;;  %v478_v7 = vrot.slane %v269_v34, 2  ;;  %v486_v34 = vrot.slane %v2590_v44, 2 }
  0x9d   : > { %v2749_v52 = vsel %vm335_vm2, %v363_v45, %v364_v46 }
  0x9e   : > { %790 = vrot.lane.b32.xlu1 %v264_v31, %s2405_s27  ;;  %v372_v31 = vrot.slane %v2590_v44, 1 }
  0x9f   : > { %788 = vrot.lane.b32.xlu0 %v262_v23, %s2405_s27 }
  0xa0   : > { %v2822_v35 = vsel %vm335_vm2, %v372_v31, %v373_v32 }
  0xa2   : > { %859 = vrot.lane.b32.xlu1 %v359_v13, %s2406_s10  ;;  %v479_v13 = vsel %vm449_vm3, %v477_v6, %v478_v7  ;;  %v279_v7 = vld [vmem:[#allocation2 + $0x108] sm:$0x3] }
  0xa3   : > { %857 = vrot.lane.b32.xlu0 %v356_v16, %s2406_s10  ;;  %v483_v16 = vrot.slane %v2554_v39, 2 }
  0xa4   : > { %v389_v42 = vpop.permute.xlu1 %388 }
  0xa5   : > { %435 = vst.msk [vmem:[#allocation3 + $0x10] sm:$0xff] %vm432_vm7, %v389_v42  ;;  %v385_v36 = vpop.permute.xlu0 %384 }
  0xa6   : > { %433 = vst.msk [vmem:[#allocation3] sm:$0xff] %vm432_vm7, %v385_v36  ;;  %863 = vrot.lane.b32.xlu1 %v845_v41, %s2406_s10  ;;  %v487_v36 = vrot.slane %v275_v29, 2 }
  0xa7   : > { %861 = vrot.lane.b32.xlu0 %v634_v27, %s2406_s10 }
  0xa8   : > { %v391_v47 = vpop.permute.xlu1 %390  ;;  %v2837_v46 = vsel %vm449_vm3, %v486_v34, %v487_v36 }
  0xa9   : > { %436 = vst.msk [vmem:[#allocation3 + $0x18] sm:$0xff] %vm432_vm7, %v391_v47  ;;  %v387_v50 = vpop.permute.xlu0 %386 }
  0xaa   : > { %434 = vst.msk [vmem:[#allocation3 + $0x8] sm:$0xff] %vm432_vm7, %v387_v50  ;;  %930 = vrot.lane.b32.xlu1 %v473_v21, %s2407_s28 }
  0xab   : > { %928 = vrot.lane.b32.xlu0 %v470_v22, %s2407_s28  ;;  %v2791_v22 = vsel %vm449_vm3, %v483_v16, %v484_v17  ;;  %v378_v17 = vrot.slane %v2693_v15, 1 }
  0xac   : > { %v501_v55 = vpop.permute.xlu1 %500 }
  0xad   : > { %548 = vst.msk [vmem:[#allocation3 + $0x8] sm:$0xff] %vm546_vm8, %v501_v55  ;;  %v499_v58 = vpop.permute.xlu0 %498  ;;  %v375_v55 = vrot.slane %v2629_v54, 1 }
  0xae   : > { %547 = vst.msk [vmem:[#allocation3] sm:$0xff] %vm546_vm8, %v499_v58  ;;  %402 = vrot.lane.b32.xlu1 %v2749_v52, %s2400_s22 }
  0xaf   : > { %400 = vrot.lane.b32.xlu0 %v362_v56, %s2400_s22 }
  0xb0   : > { %v505_v1 = vpop.permute.xlu1 %504 }
  0xb1   : > { %550 = vst.msk [vmem:[#allocation3 + $0x18] sm:$0xff] %vm546_vm8, %v505_v1  ;;  %v503_v4 = vpop.permute.xlu0 %502 }
  0xb2   : > { %549 = vst.msk [vmem:[#allocation3 + $0x10] sm:$0xff] %vm546_vm8, %v503_v4  ;;  %934 = vrot.lane.b32.xlu1 %v916_v62, %s2407_s28  ;;  %v281_v4 = vld [vmem:[#allocation2 + $0x118] sm:$0x3] }
  0xb3   : > { %932 = vrot.lane.b32.xlu0 %v705_v30, %s2407_s28 }
  0xb4   : > { %v568_v8 = vpop.permute.xlu1 %567 }
  0xb5   : > { %615 = vst.msk [vmem:[#allocation3 + $0x8] sm:$0xff] %vm613_vm9, %v568_v8  ;;  %v566_v12 = vpop.permute.xlu0 %565  ;;  %v2259_v8 = vld [vmem:[%s2451_s21 + $0x20] sm:$0xff]  }
  0xb6   : > { %614 = vst.msk [vmem:[#allocation3] sm:$0xff] %vm613_vm9, %v566_v12  ;;  %406 = vrot.lane.b32.xlu1 %v2769_v5, %s2400_s22  ;;  %v381_v12 = vrot.slane %v2691_v14, 1  ;;  %2215 = vmatprep.mubr.msk.bf16.mxu1 %vm1070_vm6, %v2259_v8 }
  0xb7   : > { %404 = vrot.lane.b32.xlu0 %v2773_v9, %s2400_s22  ;;  %2216 = vmatmul.mubr.msk.bf16.gmra.mxu1 %vm1070_vm6, %v2260_v10 }
  0xb8   : > { %v572_v18 = vpop.permute.xlu1 %571 }
  0xb9   : > { %617 = vst.msk [vmem:[#allocation3 + $0x18] sm:$0xff] %vm613_vm9, %v572_v18  ;;  %v570_v21 = vpop.permute.xlu0 %569  ;;  %v379_v18 = vrot.slane %v279_v7, 1 }
  0xba   : > { %616 = vst.msk [vmem:[#allocation3 + $0x10] sm:$0xff] %vm613_vm9, %v570_v21  ;;  %516 = vrot.lane.b32.xlu1 %v479_v13, %s2401_s23 }
  0xbb   : > { %514 = vrot.lane.b32.xlu0 %v476_v38, %s2401_s23  ;;  %v2907_v21 = vsel %vm335_vm2, %v378_v17, %v379_v18  ;;  %v1523_v18 = vld [vmem:[#allocation4 + $0x8] sm:$0xff] }
  0xbc   : > { %v641_v23 = vpop.permute.xlu1 %640 }
  0xbd   : > { %688 = vst.msk [vmem:[#allocation3 + $0x8] sm:$0xff] %vm686_vm10, %v641_v23  ;;  %v639_v25 = vpop.permute.xlu0 %638  ;;  %v495_v23 = vrot.slane %v2691_v14, 2 }
  0xbe   : > { %687 = vst.msk [vmem:[#allocation3] sm:$0xff] %vm686_vm10, %v639_v25  ;;  %520 = vrot.lane.b32.xlu1 %v2791_v22, %s2401_s23 }
  0xbf   : > { %518 = vrot.lane.b32.xlu0 %v2794_v24, %s2401_s23 }
  0xc0   : > { %v645_v26 = vpop.permute.xlu1 %644 }
  0xc1   : > { %690 = vst.msk [vmem:[#allocation3 + $0x18] sm:$0xff] %vm686_vm10, %v645_v26  ;;  %v643_v27 = vpop.permute.xlu0 %642  ;;  %v492_v26 = vrot.slane %v2693_v15, 2 }
  0xc2   : > { %689 = vst.msk [vmem:[#allocation3 + $0x10] sm:$0xff] %vm686_vm10, %v643_v27  ;;  %583 = vrot.lane.b32.xlu1 %v2556_v40, %s2402_s24  ;;  %v493_v27 = vrot.slane %v279_v7, 2 }
  0xc3   : > { %581 = vrot.lane.b32.xlu0 %v2550_v37, %s2402_s24 }
  0xc4   : > { %v712_v28 = vpop.permute.xlu1 %711  ;;  %v2927_v31 = vsel %vm449_vm3, %v492_v26, %v493_v27 }
  0xc5   : > { %759 = vst.msk [vmem:[#allocation3 + $0x8] sm:$0xff] %vm757_vm11, %v712_v28  ;;  %v710_v30 = vpop.permute.xlu0 %709 }
  0xc6   : > { %758 = vst.msk [vmem:[#allocation3] sm:$0xff] %vm757_vm11, %v710_v30  ;;  %587 = vrot.lane.b32.xlu1 %v2590_v44, %s2402_s24 }
  0xc7   : > { %585 = vrot.lane.b32.xlu0 %v2554_v39, %s2402_s24 }
  0xc8   : > { %v716_v33 = vpop.permute.xlu1 %715 }
  0xc9   : > { %761 = vst.msk [vmem:[#allocation3 + $0x18] sm:$0xff] %vm757_vm11, %v716_v33  ;;  %v714_v37 = vpop.permute.xlu0 %713 }
  0xca   : > { %760 = vst.msk [vmem:[#allocation3 + $0x10] sm:$0xff] %vm757_vm11, %v714_v37  ;;  %656 = vrot.lane.b32.xlu1 %v2773_v9, %s2403_s25 }
  0xcb   : > { %654 = vrot.lane.b32.xlu0 %v2749_v52, %s2403_s25  ;;  %v277_v52 = vld [vmem:[#allocation2 + $0xf8] sm:$0x3] }
  0xcc   : > { %v779_v41 = vpop.permute.xlu1 %778  ;;  %v490_v1 = vrot.slane %v277_v52, 2 }
  0xcd   : > { %826 = vst.msk [vmem:[#allocation3 + $0x8] sm:$0xff] %vm824_vm12, %v779_v41  ;;  %v777_v42 = vpop.permute.xlu0 %776 }
  0xce   : > { %825 = vst.msk [vmem:[#allocation3] sm:$0xff] %vm824_vm12, %v777_v42  ;;  %660 = vrot.lane.b32.xlu1 %v2822_v35, %s2403_s25  ;;  %v2890_v11 = vsel %vm449_vm3, %v489_v0, %v490_v1  ;;  %v283_v42 = vld [vmem:[#allocation2 + $0x128] sm:$0x3] }
  0xcf   : > { %658 = vrot.lane.b32.xlu0 %v2769_v5, %s2403_s25 }
  0xd0   : > { %v783_v43 = vpop.permute.xlu1 %782 }
  0xd1   : > { %828 = vst.msk [vmem:[#allocation3 + $0x18] sm:$0xff] %vm824_vm12, %v783_v43  ;;  %v781_v45 = vpop.permute.xlu0 %780  ;;  %v636_v43 = vrot.slane %v283_v42, 1 }
  0xd2   : > { %827 = vst.msk [vmem:[#allocation3 + $0x10] sm:$0xff] %vm824_vm12, %v781_v45  ;;  %727 = vrot.lane.b32.xlu1 %v2794_v24, %s2404_s26 }
  0xd3   : > { %725 = vrot.lane.b32.xlu0 %v479_v13, %s2404_s26  ;;  %v382_v13 = vrot.slane %v281_v4, 1 }
  0xd4   : > { %v852_v47 = vpop.permute.xlu1 %851 }
  0xd5   : > { %899 = vst.msk [vmem:[#allocation3 + $0x8] sm:$0xff] %vm897_vm13, %v852_v47  ;;  %v850_v48 = vpop.permute.xlu0 %849  ;;  %v2904_v19 = vsel %vm335_vm2, %v381_v12, %v382_v13 }
  0xd6   : > { %898 = vst.msk [vmem:[#allocation3] sm:$0xff] %vm897_vm13, %v850_v48  ;;  %731 = vrot.lane.b32.xlu1 %v2837_v46, %s2404_s26 }
  0xd7   : > { %729 = vrot.lane.b32.xlu0 %v2791_v22, %s2404_s26 }
  0xd8   : > { %v856_v49 = vpop.permute.xlu1 %855 }
  0xd9   : > { %901 = vst.msk [vmem:[#allocation3 + $0x18] sm:$0xff] %vm897_vm13, %v856_v49  ;;  %v854_v50 = vpop.permute.xlu0 %853 }
  0xda   : > { %900 = vst.msk [vmem:[#allocation3 + $0x10] sm:$0xff] %vm897_vm13, %v854_v50  ;;  %794 = vrot.lane.b32.xlu1 %v2554_v39, %s2405_s27  ;;  %v376_v39 = vrot.slane %v277_v52, 1  ;;  %v707_v50 = vrot.slane %v283_v42, 2 }
  0xdb   : > { %792 = vrot.lane.b32.xlu0 %v2556_v40, %s2405_s27 }
  0xdc   : > { %v923_v51 = vpop.permute.xlu1 %922  ;;  %v2865_v57 = vsel %vm335_vm2, %v375_v55, %v376_v39 }
  0xdd   : > { %970 = vst.msk [vmem:[#allocation3 + $0x8] sm:$0xff] %vm968_vm14, %v923_v51  ;;  %v921_v53 = vpop.permute.xlu0 %920 }
  0xde   : > { %969 = vst.msk [vmem:[#allocation3] sm:$0xff] %vm968_vm14, %v921_v53  ;;  %798 = vrot.lane.b32.xlu1 %v2629_v54, %s2405_s27 }
  0xdf   : > { %796 = vrot.lane.b32.xlu0 %v2590_v44, %s2405_s27 }
  0xe0   : > { %v395_v56 = vpop.permute.xlu1 %394 }
  0xe1   : > { %438 = vst.msk [vmem:[#allocation3 + $0x28] sm:$0xff] %vm432_vm7, %v395_v56  ;;  %v393_v40 = vpop.permute.xlu0 %392 }
  0xe2   : > { %437 = vst.msk [vmem:[#allocation3 + $0x20] sm:$0xff] %vm432_vm7, %v393_v40  ;;  %867 = vrot.lane.b32.xlu1 %v2769_v5, %s2406_s10 }
  0xe3   : > { %865 = vrot.lane.b32.xlu0 %v2773_v9, %s2406_s10 }
  0xe4   : > { %v927_v58 = vpop.permute.xlu1 %926  ;;  %v1011_v44 = vld [vmem:[#allocation3 + $0x8] sm:$0xff] }
  0xe5   : > { %972 = vst.msk [vmem:[#allocation3 + $0x18] sm:$0xff] %vm968_vm14, %v927_v58  ;;  %v925_v59 = vpop.permute.xlu0 %924  ;;  %v1010_v60 = vld [vmem:[#allocation3] sm:$0xff] }
  0xe6   : > { %971 = vst.msk [vmem:[#allocation3 + $0x10] sm:$0xff] %vm968_vm14, %v925_v59  ;;  %871 = vrot.lane.b32.xlu1 %v2865_v57, %s2406_s10  ;;  %v1026_v61 = vpack.c.bf16 %v1011_v44, %v1010_v60  ;;  %v285_v44 = vld [vmem:[#allocation2 + $0x138] sm:$0x3] }
  0xe7   : > { %869 = vrot.lane.b32.xlu0 %v2822_v35, %s2406_s10  ;;  %v918_v7 = vrot.slane %v285_v44, 2 }
  0xe8   : > { %2181 = vmatprep.mubr.msk.bf16.mxu0 %vm1070_vm6, %v1026_v61  ;;  %v399_v62 = vpop.permute.xlu1 %398  ;;  %v847_v61 = vrot.slane %v285_v44, 1 }
  0xe9   : > { %440 = vst.msk [vmem:[#allocation3 + $0x38] sm:$0xff] %vm432_vm7, %v399_v62  ;;  %v397_v63 = vpop.permute.xlu0 %396  ;;  %v2261_v62 = vld [vmem:[%s2451_s21 + $0x30] sm:$0xff]  }
  0xea   : > { %439 = vst.msk [vmem:[#allocation3 + $0x30] sm:$0xff] %vm432_vm7, %v397_v63  ;;  %938 = vrot.lane.b32.xlu1 %v2791_v22, %s2407_s28  ;;  %v2262_v63 = vld [vmem:[%s2451_s21 + $0x38] sm:$0xff]   ;;  %2219 = vmatprep.mubr.msk.bf16.mxu1 %vm1070_vm6, %v2261_v62 }
  0xeb   : > { %936 = vrot.lane.b32.xlu0 %v2794_v24, %s2407_s28  ;;  %v496_v24 = vrot.slane %v281_v4, 2  ;;  %2220 = vmatmul.mubr.msk.bf16.gmra.mxu1 %vm1070_vm6, %v2262_v63 }
  0xec   : > { %v509_v2 = vpop.permute.xlu1 %508  ;;  %v1013_v3 = vld [vmem:[#allocation3 + $0x18] sm:$0xff] }
  0xed   : > { %552 = vst.msk [vmem:[#allocation3 + $0x28] sm:$0xff] %vm546_vm8, %v509_v2  ;;  %v507_v5 = vpop.permute.xlu0 %506  ;;  %v1012_v6 = vld [vmem:[#allocation3 + $0x10] sm:$0xff]  ;;  %v2924_v29 = vsel %vm449_vm3, %v495_v23, %v496_v24 }
  0xee   : > { %551 = vst.msk [vmem:[#allocation3 + $0x20] sm:$0xff] %vm546_vm8, %v507_v5  ;;  %410 = vrot.lane.b32.xlu1 %v2865_v57, %s2400_s22  ;;  %v1027_v9 = vpack.c.bf16 %v1013_v3, %v1012_v6 }
  0xef   : > { %408 = vrot.lane.b32.xlu0 %v2822_v35, %s2400_s22  ;;  %v282_v35 = vld [vmem:[#allocation2 + $0x120] sm:$0xff] }
  0xf0   : > { %2182 = vmatmul.mubr.msk.bf16.vlgmr.msra.gmra.mxu0 %vm1070_vm6, %v1027_v9  ;;  %v513_v16 = vpop.permute.xlu1 %512  ;;  %v635_v36 = vrot.slane %v282_v35, 1  ;;  %v706_v49 = vrot.slane %v282_v35, 2 }
  0xf1   : > { %554 = vst.msk [vmem:[#allocation3 + $0x38] sm:$0xff] %vm546_vm8, %v513_v16  ;;  %v511_v38 = vpop.permute.xlu0 %510 }
  0xf2   : > { %553 = vst.msk [vmem:[#allocation3 + $0x30] sm:$0xff] %vm546_vm8, %v511_v38  ;;  %942 = vrot.lane.b32.xlu1 %v2890_v11, %s2407_s28  ;;  %v708_v53 = vsel %vm449_vm3, %v706_v49, %v707_v50 }
  0xf3   : > { %940 = vrot.lane.b32.xlu0 %v2837_v46, %s2407_s28 }
  0xf4   : > { %v576_v20 = vpop.permute.xlu1 %575 }
  0xf5   : > { %619 = vst.msk [vmem:[#allocation3 + $0x28] sm:$0xff] %vm613_vm9, %v576_v20  ;;  %v574_v22 = vpop.permute.xlu0 %573 }
  0xf6   : > { %618 = vst.msk [vmem:[#allocation3 + $0x20] sm:$0xff] %vm613_vm9, %v574_v22  ;;  %414 = vrot.lane.b32.xlu1 %v2904_v19, %s2400_s22 }
  0xf7   : > { %412 = vrot.lane.b32.xlu0 %v2907_v21, %s2400_s22 }
  0xf8   : > { %v580_v25 = vpop.permute.xlu1 %579 }
  0xf9   : > { %621 = vst.msk [vmem:[#allocation3 + $0x38] sm:$0xff] %vm613_vm9, %v580_v25  ;;  %v578_v28 = vpop.permute.xlu0 %577 }
  0xfa   : > { %620 = vst.msk [vmem:[#allocation3 + $0x30] sm:$0xff] %vm613_vm9, %v578_v28  ;;  %524 = vrot.lane.b32.xlu1 %v2890_v11, %s2401_s23 }
  0xfb   : > { %522 = vrot.lane.b32.xlu0 %v2837_v46, %s2401_s23 }
  0xfc   : > { %v649_v30 = vpop.permute.xlu1 %648 }
  0xfd   : > { %692 = vst.msk [vmem:[#allocation3 + $0x28] sm:$0xff] %vm686_vm10, %v649_v30  ;;  %v647_v32 = vpop.permute.xlu0 %646 }
  0xfe   : > { %691 = vst.msk [vmem:[#allocation3 + $0x20] sm:$0xff] %vm686_vm10, %v647_v32  ;;  %528 = vrot.lane.b32.xlu1 %v2924_v29, %s2401_s23 }
  0xff   : > { %526 = vrot.lane.b32.xlu0 %v2927_v31, %s2401_s23 }
 0x100   : > { %v653_v33 = vpop.permute.xlu1 %652 }
 0x101   : > { %694 = vst.msk [vmem:[#allocation3 + $0x38] sm:$0xff] %vm686_vm10, %v653_v33  ;;  %v651_v37 = vpop.permute.xlu0 %650 }
 0x102   : > { %693 = vst.msk [vmem:[#allocation3 + $0x30] sm:$0xff] %vm686_vm10, %v651_v37  ;;  %591 = vrot.lane.b32.xlu1 %v2693_v15, %s2402_s24 }
 0x103   : > { %589 = vrot.lane.b32.xlu0 %v2629_v54, %s2402_s24  ;;  %v637_v54 = vsel %vm335_vm2, %v635_v36, %v636_v43 }
 0x104   : > { %v720_v41 = vpop.permute.xlu1 %719 }
 0x105   : > { %763 = vst.msk [vmem:[#allocation3 + $0x28] sm:$0xff] %vm757_vm11, %v720_v41  ;;  %v718_v34 = vpop.permute.xlu0 %717 }
 0x106   : > { %762 = vst.msk [vmem:[#allocation3 + $0x20] sm:$0xff] %vm757_vm11, %v718_v34  ;;  %595 = vrot.lane.b32.xlu1 %v282_v35, %s2402_s24 }
 0x107   : > { %593 = vrot.lane.b32.xlu0 %v2691_v14, %s2402_s24  ;;  %s2408_s24 = smov 104  }
 0x108   : > { %v724_v45 = vpop.permute.xlu1 %723 }
 0x109   : > { %765 = vst.msk [vmem:[#allocation3 + $0x38] sm:$0xff] %vm757_vm11, %v724_v45  ;;  %v722_v46 = vpop.permute.xlu0 %721 }
 0x10a   : > { %764 = vst.msk [vmem:[#allocation3 + $0x30] sm:$0xff] %vm757_vm11, %v722_v46  ;;  %664 = vrot.lane.b32.xlu1 %v2907_v21, %s2403_s25 }
 0x10b   : > { %662 = vrot.lane.b32.xlu0 %v2865_v57, %s2403_s25  ;;  %v284_v57 = vld [vmem:[#allocation2 + $0x130] sm:$0xff] }
 0x10c   : > { %v787_v47 = vpop.permute.xlu1 %786  ;;  %v846_v60 = vrot.slane %v284_v57, 1  ;;  %v917_v6 = vrot.slane %v284_v57, 2 }
 0x10d   : > { %830 = vst.msk [vmem:[#allocation3 + $0x28] sm:$0xff] %vm824_vm12, %v787_v47  ;;  %v785_v48 = vpop.permute.xlu0 %784 }
 0x10e   : > { %829 = vst.msk [vmem:[#allocation3 + $0x20] sm:$0xff] %vm824_vm12, %v785_v48  ;;  %668 = vrot.lane.b32.xlu1 %v637_v54, %s2403_s25  ;;  %v848_v0 = vsel %vm335_vm2, %v846_v60, %v847_v61  ;;  %v919_v10 = vsel %vm449_vm3, %v917_v6, %v918_v7 }
 0x10f   : > { %666 = vrot.lane.b32.xlu0 %v2904_v19, %s2403_s25  ;;  %s2409_s25 = smov 120  }
 0x110   : > { %v791_v51 = vpop.permute.xlu1 %790 }
 0x111   : > { %832 = vst.msk [vmem:[#allocation3 + $0x38] sm:$0xff] %vm824_vm12, %v791_v51  ;;  %v789_v52 = vpop.permute.xlu0 %788 }
 0x112   : > { %831 = vst.msk [vmem:[#allocation3 + $0x30] sm:$0xff] %vm824_vm12, %v789_v52  ;;  %735 = vrot.lane.b32.xlu1 %v2927_v31, %s2404_s26 }
 0x113   : > { %733 = vrot.lane.b32.xlu0 %v2890_v11, %s2404_s26 }
 0x114   : > { %v860_v55 = vpop.permute.xlu1 %859 }
 0x115   : > { %903 = vst.msk [vmem:[#allocation3 + $0x28] sm:$0xff] %vm897_vm13, %v860_v55  ;;  %v858_v39 = vpop.permute.xlu0 %857 }
 0x116   : > { %902 = vst.msk [vmem:[#allocation3 + $0x20] sm:$0xff] %vm897_vm13, %v858_v39  ;;  %739 = vrot.lane.b32.xlu1 %v708_v53, %s2404_s26 }
 0x117   : > { %737 = vrot.lane.b32.xlu0 %v2924_v29, %s2404_s26 }
 0x118   : > { %v864_v56 = vpop.permute.xlu1 %863 }
 0x119   : > { %905 = vst.msk [vmem:[#allocation3 + $0x38] sm:$0xff] %vm897_vm13, %v864_v56  ;;  %v862_v40 = vpop.permute.xlu0 %861 }
 0x11a   : > { %904 = vst.msk [vmem:[#allocation3 + $0x30] sm:$0xff] %vm897_vm13, %v862_v40  ;;  %802 = vrot.lane.b32.xlu1 %v2691_v14, %s2405_s27 }
 0x11b   : > { %800 = vrot.lane.b32.xlu0 %v2693_v15, %s2405_s27 }
 0x11c   : > { %v931_v58 = vpop.permute.xlu1 %930 }
 0x11d   : > { %974 = vst.msk [vmem:[#allocation3 + $0x28] sm:$0xff] %vm968_vm14, %v931_v58  ;;  %v929_v59 = vpop.permute.xlu0 %928 }
 0x11e   : > { %973 = vst.msk [vmem:[#allocation3 + $0x20] sm:$0xff] %vm968_vm14, %v929_v59  ;;  %806 = vrot.lane.b32.xlu1 %v284_v57, %s2405_s27 }
 0x11f   : > { %804 = vrot.lane.b32.xlu0 %v282_v35, %s2405_s27 }
 0x120   : > { %v403_v14 = vpop.permute.xlu1 %402 }
 0x121   : > { %442 = vst.msk [vmem:[#allocation3 + $0x48] sm:$0xff] %vm432_vm7, %v403_v14  ;;  %v401_v15 = vpop.permute.xlu0 %400 }
 0x122   : > { %441 = vst.msk [vmem:[#allocation3 + $0x40] sm:$0xff] %vm432_vm7, %v401_v15  ;;  %875 = vrot.lane.b32.xlu1 %v2904_v19, %s2406_s10  ;;  %v1522_v19 = vld [vmem:[#allocation4] sm:$0xff] }
 0x123   : > { %873 = vrot.lane.b32.xlu0 %v2907_v21, %s2406_s10 }
 0x124   : > { %v935_v1 = vpop.permute.xlu1 %934  ;;  %v1015_v2 = vld [vmem:[#allocation3 + $0x28] sm:$0xff] }
 0x125   : > { %976 = vst.msk [vmem:[#allocation3 + $0x38] sm:$0xff] %vm968_vm14, %v935_v1  ;;  %v933_v3 = vpop.permute.xlu0 %932  ;;  %v1014_v4 = vld [vmem:[#allocation3 + $0x20] sm:$0xff] }
 0x126   : > { %975 = vst.msk [vmem:[#allocation3 + $0x30] sm:$0xff] %vm968_vm14, %v933_v3  ;;  %879 = vrot.lane.b32.xlu1 %v848_v0, %s2406_s10  ;;  %v1028_v5 = vpack.c.bf16 %v1015_v2, %v1014_v4 }
 0x127   : > { %877 = vrot.lane.b32.xlu0 %v637_v54, %s2406_s10 }
 0x128   : > { %2185 = vmatprep.mubr.msk.bf16.mxu0 %vm1070_vm6, %v1028_v5  ;;  %v407_v8 = vpop.permute.xlu1 %406 }
 0x129   : > { %444 = vst.msk [vmem:[#allocation3 + $0x58] sm:$0xff] %vm432_vm7, %v407_v8  ;;  %v405_v9 = vpop.permute.xlu0 %404 }
 0x12a   : > { %443 = vst.msk [vmem:[#allocation3 + $0x50] sm:$0xff] %vm432_vm7, %v405_v9  ;;  %946 = vrot.lane.b32.xlu1 %v2924_v29, %s2407_s28 }
 0x12b   : > { %944 = vrot.lane.b32.xlu0 %v2927_v31, %s2407_s28 }
 0x12c   : > { %v517_v11 = vpop.permute.xlu1 %516  ;;  %v1017_v12 = vld [vmem:[#allocation3 + $0x38] sm:$0xff] }
 0x12d   : > { %556 = vst.msk [vmem:[#allocation3 + $0x48] sm:$0xff] %vm546_vm8, %v517_v11  ;;  %v515_v13 = vpop.permute.xlu0 %514  ;;  %v1016_v16 = vld [vmem:[#allocation3 + $0x30] sm:$0xff] }
 0x12e   : > { %555 = vst.msk [vmem:[#allocation3 + $0x40] sm:$0xff] %vm546_vm8, %v515_v13  ;;  %950 = vrot.lane.b32.xlu1 %v919_v10, %s2407_s28  ;;  %v1029_v17 = vpack.c.bf16 %v1017_v12, %v1016_v16 }
 0x12f   : > { %948 = vrot.lane.b32.xlu0 %v708_v53, %s2407_s28 }
 0x130   : > { %2186 = vmatmul.mubr.msk.bf16.gmra.mxu0 %vm1070_vm6, %v1029_v17  ;;  %v521_v38 = vpop.permute.xlu1 %520 }
 0x131   : > { %558 = vst.msk [vmem:[#allocation3 + $0x58] sm:$0xff] %vm546_vm8, %v521_v38  ;;  %v519_v20 = vpop.permute.xlu0 %518 }
 0x132   : > { %557 = vst.msk [vmem:[#allocation3 + $0x50] sm:$0xff] %vm546_vm8, %v519_v20  ;;  %1556 = vrot.lane.b32.xlu1 %v1523_v18, %s2400_s22 }
 0x133   : > { %1554 = vrot.lane.b32.xlu0 %v1522_v19, %s2400_s22 }
 0x134   : > { %v584_v21 = vpop.permute.xlu1 %583 }
 0x135   : > { %623 = vst.msk [vmem:[#allocation3 + $0x48] sm:$0xff] %vm613_vm9, %v584_v21  ;;  %v582_v22 = vpop.permute.xlu0 %581 }
 0x136   : > { %622 = vst.msk [vmem:[#allocation3 + $0x40] sm:$0xff] %vm613_vm9, %v582_v22 }
 0x138   : > { %v588_v23 = vpop.permute.xlu1 %587 }
 0x139   : > { %625 = vst.msk [vmem:[#allocation3 + $0x58] sm:$0xff] %vm613_vm9, %v588_v23  ;;  %v586_v24 = vpop.permute.xlu0 %585  ;;  %v2209_v23 = vpop.f32.mrf.mxu1 }
 0x13a   : > { %624 = vst.msk [vmem:[#allocation3 + $0x50] sm:$0xff] %vm613_vm9, %v586_v24 }
 0x13c   : > { %v657_v25 = vpop.permute.xlu1 %656 }
 0x13d   : > { %696 = vst.msk [vmem:[#allocation3 + $0x48] sm:$0xff] %vm686_vm10, %v657_v25  ;;  %v655_v26 = vpop.permute.xlu0 %654 }
 0x13e   : > { %695 = vst.msk [vmem:[#allocation3 + $0x40] sm:$0xff] %vm686_vm10, %v655_v26  ;;  %v1324_v26 = vpop.f32.mrf.mxu1 }
 0x140   : > { %v661_v27 = vpop.permute.xlu1 %660 }
 0x141   : > { %698 = vst.msk [vmem:[#allocation3 + $0x58] sm:$0xff] %vm686_vm10, %v661_v27  ;;  %v659_v28 = vpop.permute.xlu0 %658 }
 0x142   : > { %697 = vst.msk [vmem:[#allocation3 + $0x50] sm:$0xff] %vm686_vm10, %v659_v28  ;;  %v3075_v28 = vld [vmem:[%s3483_s3] ss:$0 sm:$0xff] }
 0x144   : > { %v728_v29 = vpop.permute.xlu1 %727 }
 0x145   : > { %767 = vst.msk [vmem:[#allocation3 + $0x48] sm:$0xff] %vm757_vm11, %v728_v29  ;;  %v726_v30 = vpop.permute.xlu0 %725  ;;  %v2210_v29 = vpop.f32.mrf.mxu1 }
 0x146   : > { %766 = vst.msk [vmem:[#allocation3 + $0x40] sm:$0xff] %vm757_vm11, %v726_v30 }
 0x148   : > { %v732_v31 = vpop.permute.xlu1 %731 }
 0x149   : > { %769 = vst.msk [vmem:[#allocation3 + $0x58] sm:$0xff] %vm757_vm11, %v732_v31  ;;  %v730_v32 = vpop.permute.xlu0 %729 }
 0x14a   : > { %768 = vst.msk [vmem:[#allocation3 + $0x50] sm:$0xff] %vm757_vm11, %v730_v32 }
 0x14c   : > { %v795_v33 = vpop.permute.xlu1 %794 }
 0x14d   : > { %834 = vst.msk [vmem:[#allocation3 + $0x48] sm:$0xff] %vm824_vm12, %v795_v33  ;;  %v793_v37 = vpop.permute.xlu0 %792 }
 0x14e   : > { %833 = vst.msk [vmem:[#allocation3 + $0x40] sm:$0xff] %vm824_vm12, %v793_v37 }
 0x150   : > { %v799_v35 = vpop.permute.xlu1 %798 }
 0x151   : > { %836 = vst.msk [vmem:[#allocation3 + $0x58] sm:$0xff] %vm824_vm12, %v799_v35  ;;  %v797_v41 = vpop.permute.xlu0 %796  ;;  %v1327_v35 = vpop.f32.mrf.mxu1 }
 0x152   : > { %835 = vst.msk [vmem:[#allocation3 + $0x50] sm:$0xff] %vm824_vm12, %v797_v41 }
 0x154   : > { %v868_v42 = vpop.permute.xlu1 %867 }
 0x155   : > { %907 = vst.msk [vmem:[#allocation3 + $0x48] sm:$0xff] %vm897_vm13, %v868_v42  ;;  %v866_v34 = vpop.permute.xlu0 %865 }
 0x156   : > { %906 = vst.msk [vmem:[#allocation3 + $0x40] sm:$0xff] %vm897_vm13, %v866_v34 }
 0x158   : > { %v872_v36 = vpop.permute.xlu1 %871 }
 0x159   : > { %909 = vst.msk [vmem:[#allocation3 + $0x58] sm:$0xff] %vm897_vm13, %v872_v36  ;;  %v870_v43 = vpop.permute.xlu0 %869 }
 0x15a   : > { %908 = vst.msk [vmem:[#allocation3 + $0x50] sm:$0xff] %vm897_vm13, %v870_v43 }
 0x15c   : > { %v939_v45 = vpop.permute.xlu1 %938 }
 0x15d   : > { %978 = vst.msk [vmem:[#allocation3 + $0x48] sm:$0xff] %vm968_vm14, %v939_v45  ;;  %v937_v46 = vpop.permute.xlu0 %936 }
 0x15e   : > { %977 = vst.msk [vmem:[#allocation3 + $0x40] sm:$0xff] %vm968_vm14, %v937_v46 }
 0x160   : > { %v411_v54 = vpop.permute.xlu1 %410 }
 0x161   : > { %446 = vst.msk [vmem:[#allocation3 + $0x68] sm:$0xff] %vm432_vm7, %v411_v54  ;;  %v409_v47 = vpop.permute.xlu0 %408 }
 0x162   : > { %445 = vst.msk [vmem:[#allocation3 + $0x60] sm:$0xff] %vm432_vm7, %v409_v47 }
 0x164   : > { %v943_v48 = vpop.permute.xlu1 %942  ;;  %v1019_v49 = vld [vmem:[#allocation3 + $0x48] sm:$0xff] }
 0x165   : > { %980 = vst.msk [vmem:[#allocation3 + $0x58] sm:$0xff] %vm968_vm14, %v943_v48  ;;  %v941_v50 = vpop.permute.xlu0 %940  ;;  %v1018_v51 = vld [vmem:[#allocation3 + $0x40] sm:$0xff] }
 0x166   : > { %979 = vst.msk [vmem:[#allocation3 + $0x50] sm:$0xff] %vm968_vm14, %v941_v50  ;;  %v1030_v52 = vpack.c.bf16 %v1019_v49, %v1018_v51  ;;  %v2213_v49 = vpop.f32.mrf.mxu1 }
 0x168   : > { %2189 = vmatprep.mubr.msk.bf16.mxu0 %vm1070_vm6, %v1030_v52  ;;  %v415_v53 = vpop.permute.xlu1 %414  ;;  %v1340_v50 = vpop.f32.mrf.mxu1 }
 0x169   : > { %448 = vst.msk [vmem:[#allocation3 + $0x78] sm:$0xff] %vm432_vm7, %v415_v53  ;;  %v413_v55 = vpop.permute.xlu0 %412 }
 0x16a   : > { %447 = vst.msk [vmem:[#allocation3 + $0x70] sm:$0xff] %vm432_vm7, %v413_v55  ;;  %v2214_v52 = vpop.f32.mrf.mxu1 }
 0x16c   : > { %v525_v39 = vpop.permute.xlu1 %524  ;;  %v1021_v56 = vld [vmem:[#allocation3 + $0x58] sm:$0xff] }
 0x16d   : > { %560 = vst.msk [vmem:[#allocation3 + $0x68] sm:$0xff] %vm546_vm8, %v525_v39  ;;  %v523_v40 = vpop.permute.xlu0 %522  ;;  %v1020_v57 = vld [vmem:[#allocation3 + $0x50] sm:$0xff] }
 0x16e   : > { %559 = vst.msk [vmem:[#allocation3 + $0x60] sm:$0xff] %vm546_vm8, %v523_v40  ;;  %v1031_v58 = vpack.c.bf16 %v1021_v56, %v1020_v57  ;;  %v1343_v57 = vpop.f32.mrf.mxu1 }
 0x170   : > { %2190 = vmatmul.mubr.msk.bf16.gmra.mxu0 %vm1070_vm6, %v1031_v58  ;;  %v529_v44 = vpop.permute.xlu1 %528 }
 0x171   : > { %562 = vst.msk [vmem:[#allocation3 + $0x78] sm:$0xff] %vm546_vm8, %v529_v44  ;;  %v527_v59 = vpop.permute.xlu0 %526 }
 0x172   : > { %561 = vst.msk [vmem:[#allocation3 + $0x70] sm:$0xff] %vm546_vm8, %v527_v59 }
 0x174   : > { %v592_v60 = vpop.permute.xlu1 %591 }
 0x175   : > { %627 = vst.msk [vmem:[#allocation3 + $0x68] sm:$0xff] %vm613_vm9, %v592_v60  ;;  %v590_v61 = vpop.permute.xlu0 %589 }
 0x176   : > { %626 = vst.msk [vmem:[#allocation3 + $0x60] sm:$0xff] %vm613_vm9, %v590_v61 }
 0x178   : > { %v596_v14 = vpop.permute.xlu1 %595 }
 0x179   : > { %629 = vst.msk [vmem:[#allocation3 + $0x78] sm:$0xff] %vm613_vm9, %v596_v14  ;;  %v594_v15 = vpop.permute.xlu0 %593 }
 0x17a   : > { %628 = vst.msk [vmem:[#allocation3 + $0x70] sm:$0xff] %vm613_vm9, %v594_v15 }
 0x17c   : > { %v665_v62 = vpop.permute.xlu1 %664 }
 0x17d   : > { %700 = vst.msk [vmem:[#allocation3 + $0x68] sm:$0xff] %vm686_vm10, %v665_v62  ;;  %v663_v63 = vpop.permute.xlu0 %662 }
 0x17e   : > { %699 = vst.msk [vmem:[#allocation3 + $0x60] sm:$0xff] %vm686_vm10, %v663_v63 }
 0x180   : > { %v669_v0 = vpop.permute.xlu1 %668 }
 0x181   : > { %702 = vst.msk [vmem:[#allocation3 + $0x78] sm:$0xff] %vm686_vm10, %v669_v0  ;;  %v667_v1 = vpop.permute.xlu0 %666 }
 0x182   : > { %701 = vst.msk [vmem:[#allocation3 + $0x70] sm:$0xff] %vm686_vm10, %v667_v1  ;;  %v2217_v1 = vpop.f32.mrf.mxu1 }
 0x184   : > { %v736_v2 = vpop.permute.xlu1 %735 }
 0x185   : > { %771 = vst.msk [vmem:[#allocation3 + $0x68] sm:$0xff] %vm757_vm11, %v736_v2  ;;  %v734_v3 = vpop.permute.xlu0 %733  ;;  %v1356_v2 = vpop.f32.mrf.mxu1 }
 0x186   : > { %770 = vst.msk [vmem:[#allocation3 + $0x60] sm:$0xff] %vm757_vm11, %v734_v3 }
 0x188   : > { %v740_v4 = vpop.permute.xlu1 %739 }
 0x189   : > { %773 = vst.msk [vmem:[#allocation3 + $0x78] sm:$0xff] %vm757_vm11, %v740_v4  ;;  %v738_v5 = vpop.permute.xlu0 %737  ;;  %v2218_v4 = vpop.f32.mrf.mxu1 }
 0x18a   : > { %772 = vst.msk [vmem:[#allocation3 + $0x70] sm:$0xff] %vm757_vm11, %v738_v5 }
 0x18c   : > { %v803_v6 = vpop.permute.xlu1 %802 }
 0x18d   : > { %838 = vst.msk [vmem:[#allocation3 + $0x68] sm:$0xff] %vm824_vm12, %v803_v6  ;;  %v801_v7 = vpop.permute.xlu0 %800 }
 0x18e   : > { %837 = vst.msk [vmem:[#allocation3 + $0x60] sm:$0xff] %vm824_vm12, %v801_v7 }
 0x190   : > { %v807_v8 = vpop.permute.xlu1 %806 }
 0x191   : > { %840 = vst.msk [vmem:[#allocation3 + $0x78] sm:$0xff] %vm824_vm12, %v807_v8  ;;  %v805_v9 = vpop.permute.xlu0 %804 }
 0x192   : > { %839 = vst.msk [vmem:[#allocation3 + $0x70] sm:$0xff] %vm824_vm12, %v805_v9 }
 0x194   : > { %v876_v10 = vpop.permute.xlu1 %875 }
 0x195   : > { %911 = vst.msk [vmem:[#allocation3 + $0x68] sm:$0xff] %vm897_vm13, %v876_v10  ;;  %v874_v11 = vpop.permute.xlu0 %873  ;;  %v1359_v10 = vpop.f32.mrf.mxu1 }
 0x196   : > { %910 = vst.msk [vmem:[#allocation3 + $0x60] sm:$0xff] %vm897_vm13, %v874_v11 }
 0x198   : > { %v880_v12 = vpop.permute.xlu1 %879 }
 0x199   : > { %913 = vst.msk [vmem:[#allocation3 + $0x78] sm:$0xff] %vm897_vm13, %v880_v12  ;;  %v878_v13 = vpop.permute.xlu0 %877 }
 0x19a   : > { %912 = vst.msk [vmem:[#allocation3 + $0x70] sm:$0xff] %vm897_vm13, %v878_v13 }
 0x19c   : > { %v947_v16 = vpop.permute.xlu1 %946 }
 0x19d   : > { %982 = vst.msk [vmem:[#allocation3 + $0x68] sm:$0xff] %vm968_vm14, %v947_v16  ;;  %v945_v17 = vpop.permute.xlu0 %944 }
 0x19e   : > { %981 = vst.msk [vmem:[#allocation3 + $0x60] sm:$0xff] %vm968_vm14, %v945_v17 }
 0x1a0   : > { %v951_v18 = vpop.permute.xlu1 %950 }
 0x1a1   : > { %984 = vst.msk [vmem:[#allocation3 + $0x78] sm:$0xff] %vm968_vm14, %v951_v18  ;;  %v949_v38 = vpop.permute.xlu0 %948 }
 0x1a2   : > { %983 = vst.msk [vmem:[#allocation3 + $0x70] sm:$0xff] %vm968_vm14, %v949_v38 }
 0x1a4   : > { %v1023_v19 = vld [vmem:[#allocation3 + $0x68] sm:$0xff] }
 0x1a5   : > { %v1022_v20 = vld [vmem:[#allocation3 + $0x60] sm:$0xff] }
 0x1a6   : > { %v1032_v21 = vpack.c.bf16 %v1023_v19, %v1022_v20 }
 0x1a8   : > { %2193 = vmatprep.mubr.msk.bf16.mxu0 %vm1070_vm6, %v1032_v21  ;;  %v1025_v22 = vld [vmem:[#allocation3 + $0x78] sm:$0xff] }
 0x1a9   : > { %v1024_v24 = vld [vmem:[#allocation3 + $0x70] sm:$0xff] }
 0x1aa   : > { %v1033_v25 = vpack.c.bf16 %v1025_v22, %v1024_v24 }
 0x1ab   : > { %v2221_v22 = vpop.f32.mrf.mxu1 }
 0x1ac   : > { %2194 = vmatmul.mubr.msk.bf16.gmra.mxu0 %vm1070_vm6, %v1033_v25 }
 0x1b0   : > { %v2183_v27 = vpop.f32.mrf.mxu0 }
 0x1b1   : > { %v1333_v30 = vadd.f32 %v2209_v23, %v2183_v27  ;;  %v1372_v23 = vpop.f32.mrf.mxu1 }
 0x1b2   : > { %v1133_v31 = vpop.f32.mrf.mxu0 }
 0x1b3   : > { %v3078_v32 = vadd.f32 %v3075_v28, %v1333_v30  ;;  %v1325_v33 = vadd.f32 %v1324_v26, %v1133_v31  ;;  %v2222_v26 = vpop.f32.mrf.mxu1 }
 0x1b4   : > { %v2184_v37 = vpop.f32.mrf.mxu0 }
 0x1b5   : > { %2263 = vtanh.f32 %v3078_v32  ;;  %v3082_v41 = vadd.f32 %v3075_v28, %v1325_v33  ;;  %v1336_v42 = vadd.f32 %v2210_v29, %v2184_v37 }
 0x1b6   : > { %v1136_v34 = vpop.f32.mrf.mxu0 }
 0x1b7   : > { %v3085_v36 = vadd.f32 %v3075_v28, %v1336_v42  ;;  %v1328_v43 = vadd.f32 %v1327_v35, %v1136_v34  ;;  %2265 = vtanh.f32 %v3082_v41  ;;  %v1375_v35 = vpop.f32.mrf.mxu1 }
 0x1b9   : > { %2267 = vtanh.f32 %v3085_v36  ;;  %v3090_v45 = vadd.f32 %v3075_v28, %v1328_v43 }
 0x1bb   : > { %2269 = vtanh.f32 %v3090_v45 }
 0x1c2   : > { %v2264_v46 = vpop.eup %2263 }
 0x1c3   : > { %1638 = vrot.lane.b32.xlu0 %v2264_v46, %s2408_s24 }
 0x1c4   : > { %v2266_v54 = vpop.eup %2265 }
 0x1c6   : > { %v2268_v47 = vpop.eup %2267 }
 0x1c7   : > { %1634 = vrot.lane.b32.xlu0 %v2266_v54, %s2408_s24  ;;  %1640 = vrot.lane.b32.xlu1 %v2268_v47, %s2408_s24  ;;  %v2127_v54 = vmul.f32 -1.442695, %v3078_v32  ;;  %v1524_v32 = vld [vmem:[#allocation4 + $0x10] sm:$0xff] }
 0x1c8   : > { %v2270_v48 = vpop.eup %2269 }
 0x1cb   : > { %1636 = vrot.lane.b32.xlu1 %v2270_v48, %s2408_s24  ;;  %v2125_v48 = vmul.f32 -1.442695, %v3082_v41 }
 0x1f0   : > { %v2187_v51 = vpop.f32.mrf.mxu0 }
 0x1f1   : > { %v1349_v53 = vadd.f32 %v2213_v49, %v2187_v51  ;;  %v2128_v49 = vmul.f32 -1.442695, %v3085_v36 }
 0x1f2   : > { %v1149_v55 = vpop.f32.mrf.mxu0 }
 0x1f3   : > { %v3098_v39 = vadd.f32 %v3075_v28, %v1349_v53  ;;  %v1341_v56 = vadd.f32 %v1340_v50, %v1149_v55  ;;  %v1526_v55 = vld [vmem:[#allocation4 + $0x20] sm:$0xff] }
 0x1f4   : > { %v2188_v40 = vpop.f32.mrf.mxu0 }
 0x1f5   : > { %2271 = vtanh.f32 %v3098_v39  ;;  %v3102_v58 = vadd.f32 %v3075_v28, %v1341_v56  ;;  %v1352_v44 = vadd.f32 %v2214_v52, %v2188_v40  ;;  %v2131_v52 = vmul.f32 -1.442695, %v3098_v39  ;;  %v1525_v39 = vld [vmem:[#allocation4 + $0x18] sm:$0xff]  ;;  %v1528_v40 = vld [vmem:[#allocation4 + $0x30] sm:$0xff] }
 0x1f6   : > { %v1152_v59 = vpop.f32.mrf.mxu0 }
 0x1f7   : > { %v3105_v60 = vadd.f32 %v3075_v28, %v1352_v44  ;;  %v1344_v61 = vadd.f32 %v1343_v57, %v1152_v59  ;;  %2273 = vtanh.f32 %v3102_v58  ;;  %v2129_v41 = vmul.f32 -1.442695, %v3102_v58  ;;  %v1527_v57 = vld [vmem:[#allocation4 + $0x28] sm:$0xff] }
 0x1f9   : > { %2275 = vtanh.f32 %v3105_v60  ;;  %v3110_v14 = vadd.f32 %v3075_v28, %v1344_v61  ;;  %v2132_v36 = vmul.f32 -1.442695, %v3105_v60  ;;  %v1530_v61 = vld [vmem:[#allocation4 + $0x40] sm:$0xff] }
 0x1fb   : > { %2277 = vtanh.f32 %v3110_v14  ;;  %v2130_v56 = vmul.f32 -1.442695, %v3110_v14 }
 0x202   : > { %v2272_v15 = vpop.eup %2271 }
 0x203   : > { %1646 = vrot.lane.b32.xlu0 %v2272_v15, %s2408_s24  ;;  %v1529_v15 = vld [vmem:[#allocation4 + $0x38] sm:$0xff] }
 0x204   : > { %v2274_v62 = vpop.eup %2273 }
 0x206   : > { %v2276_v63 = vpop.eup %2275 }
 0x207   : > { %1642 = vrot.lane.b32.xlu0 %v2274_v62, %s2408_s24  ;;  %1648 = vrot.lane.b32.xlu1 %v2276_v63, %s2408_s24 }
 0x208   : > { %v2278_v0 = vpop.eup %2277 }
 0x20b   : > { %1644 = vrot.lane.b32.xlu1 %v2278_v0, %s2408_s24 }
 0x230   : > { %v2191_v3 = vpop.f32.mrf.mxu0 }
 0x231   : > { %v1365_v5 = vadd.f32 %v2217_v1, %v2191_v3  ;;  %v1532_v1 = vld [vmem:[#allocation4 + $0x50] sm:$0xff] }
 0x232   : > { %v1165_v6 = vpop.f32.mrf.mxu0 }
 0x233   : > { %v3118_v7 = vadd.f32 %v3075_v28, %v1365_v5  ;;  %v1357_v8 = vadd.f32 %v1356_v2, %v1165_v6  ;;  %v3175_v5 = vpop.permute.xlu0 %1554 }
 0x234   : > { %v2192_v9 = vpop.f32.mrf.mxu0 }
 0x235   : > { %2279 = vtanh.f32 %v3118_v7  ;;  %v3122_v11 = vadd.f32 %v3075_v28, %v1357_v8  ;;  %v1368_v12 = vadd.f32 %v2218_v4, %v2192_v9  ;;  %v2135_v60 = vmul.f32 -1.442695, %v3118_v7  ;;  %v1531_v4 = vld [vmem:[#allocation4 + $0x48] sm:$0xff]  ;;  %v1534_v9 = vld [vmem:[#allocation4 + $0x60] sm:$0xff] }
 0x236   : > { %v1168_v13 = vpop.f32.mrf.mxu0 }
 0x237   : > { %v3125_v16 = vadd.f32 %v3075_v28, %v1368_v12  ;;  %v1360_v17 = vadd.f32 %v1359_v10, %v1168_v13  ;;  %2281 = vtanh.f32 %v3122_v11  ;;  %v2133_v0 = vmul.f32 -1.442695, %v3122_v11  ;;  %v1533_v12 = vld [vmem:[#allocation4 + $0x58] sm:$0xff]  ;;  %v1639_v13 = vpop.permute.xlu0 %1638 }
 0x239   : > { %2283 = vtanh.f32 %v3125_v16  ;;  %v3130_v18 = vadd.f32 %v3075_v28, %v1360_v17  ;;  %v2136_v3 = vmul.f32 -1.442695, %v3125_v16  ;;  %v3180_v16 = vpop.permute.xlu1 %1556 }
 0x23b   : > { %2285 = vtanh.f32 %v3130_v18  ;;  %v2134_v11 = vmul.f32 -1.442695, %v3130_v18 }
 0x242   : > { %v2280_v38 = vpop.eup %2279 }
 0x243   : > { %1654 = vrot.lane.b32.xlu0 %v2280_v38, %s2408_s24 }
 0x244   : > { %v2282_v19 = vpop.eup %2281 }
 0x246   : > { %v2284_v20 = vpop.eup %2283 }
 0x247   : > { %1650 = vrot.lane.b32.xlu0 %v2282_v19, %s2408_s24  ;;  %1656 = vrot.lane.b32.xlu1 %v2284_v20, %s2408_s24  ;;  %v1536_v19 = vld [vmem:[#allocation4 + $0x70] sm:$0xff] }
 0x248   : > { %v2286_v21 = vpop.eup %2285 }
 0x24b   : > { %1652 = vrot.lane.b32.xlu1 %v2286_v21, %s2408_s24  ;;  %v1535_v21 = vld [vmem:[#allocation4 + $0x68] sm:$0xff] }
 0x26c   : > { %v2195_v24 = vpop.f32.mrf.mxu0 }
 0x26d   : > { %v1381_v25 = vadd.f32 %v2221_v22, %v2195_v24  ;;  %v1641_v22 = vpop.permute.xlu1 %1640  ;;  %v1635_v24 = vpop.permute.xlu0 %1634 }
 0x26e   : > { %v1181_v27 = vpop.f32.mrf.mxu0 }
 0x26f   : > { %v3138_v29 = vadd.f32 %v3075_v28, %v1381_v25  ;;  %v1373_v30 = vadd.f32 %v1372_v23, %v1181_v27  ;;  %v1537_v27 = vld [vmem:[#allocation4 + $0x78] sm:$0xff] }
 0x270   : > { %v2196_v31 = vpop.f32.mrf.mxu0 }
 0x271   : > { %2287 = vtanh.f32 %v3138_v29  ;;  %v3142_v33 = vadd.f32 %v3075_v28, %v1373_v30  ;;  %v1384_v37 = vadd.f32 %v2222_v26, %v2196_v31 }
 0x272   : > { %v1184_v42 = vpop.f32.mrf.mxu0 }
 0x273   : > { %v3145_v34 = vadd.f32 %v3075_v28, %v1384_v37  ;;  %v1376_v43 = vadd.f32 %v1375_v35, %v1184_v42  ;;  %2289 = vtanh.f32 %v3142_v33 }
 0x275   : > { %2291 = vtanh.f32 %v3145_v34  ;;  %v3150_v46 = vadd.f32 %v3075_v28, %v1376_v43  ;;  %v2126_v28 = vmul.f32 -1.442695, %v3090_v45  ;;  %v1647_v35 = vpop.permute.xlu0 %1646 }
 0x277   : > { %2293 = vtanh.f32 %v3150_v46 }
 0x278   : > { %2295 = vpow2.f32 %v2127_v54  ;;  %v1637_v54 = vpop.permute.xlu1 %1636 }
 0x279   : > { %2297 = vpow2.f32 %v2125_v48 }
 0x27a   : > { %2299 = vpow2.f32 %v2128_v49 }
 0x27b   : > { %2301 = vpow2.f32 %v2131_v52 }
 0x27c   : > { %2303 = vpow2.f32 %v2126_v28 }
 0x27d   : > { %2305 = vpow2.f32 %v2129_v41 }
 0x27e   : > { %v2288_v47 = vpop.eup %2287  ;;  %2307 = vpow2.f32 %v2132_v36  ;;  %v1643_v36 = vpop.permute.xlu0 %1642 }
 0x27f   : > { %1662 = vrot.lane.b32.xlu0 %v2288_v47, %s2408_s24  ;;  %2309 = vpow2.f32 %v2130_v56 }
 0x280   : > { %v2290_v50 = vpop.eup %2289 }
 0x282   : > { %v2292_v51 = vpop.eup %2291 }
 0x283   : > { %1658 = vrot.lane.b32.xlu0 %v2290_v50, %s2408_s24  ;;  %1664 = vrot.lane.b32.xlu1 %v2292_v51, %s2408_s24 }
 0x284   : > { %v2294_v53 = vpop.eup %2293 }
 0x285   : > { %v2296_v45 = vpop.eup %2295 }
 0x286   : > { %v2298_v58 = vpop.eup %2297  ;;  %v1460_v44 = vadd.f32 1.0, %v2296_v45 }
 0x287   : > { %1558 = vrot.lane.b32.xlu0 %v1524_v32, %s2400_s22  ;;  %1660 = vrot.lane.b32.xlu1 %v2294_v53, %s2408_s24  ;;  %v2300_v59 = vpop.eup %2299  ;;  %v1458_v62 = vadd.f32 1.0, %v2298_v58  ;;  %v1649_v32 = vpop.permute.xlu1 %1648 }
 0x288   : > { %2311 = vrcp.f32 %v1460_v44  ;;  %v1461_v63 = vadd.f32 1.0, %v2300_v59  ;;  %v2302_v14 = vpop.eup %2301 }
 0x289   : > { %2313 = vpow2.f32 %v2135_v60  ;;  %v2304_v2 = vpop.eup %2303  ;;  %v1464_v6 = vadd.f32 1.0, %v2302_v14 }
 0x28a   : > { %2315 = vrcp.f32 %v1458_v62  ;;  %v2306_v7 = vpop.eup %2305  ;;  %v1459_v8 = vadd.f32 1.0, %v2304_v2 }
 0x28b   : > { %1562 = vrot.lane.b32.xlu0 %v1526_v55, %s2400_s22  ;;  %1560 = vrot.lane.b32.xlu1 %v1525_v39, %s2400_s22  ;;  %2317 = vrcp.f32 %v1461_v63  ;;  %v2308_v10 = vpop.eup %2307  ;;  %v1462_v17 = vadd.f32 1.0, %v2306_v7  ;;  %v2139_v7 = vmul.f32 -1.442695, %v3138_v29 }
 0x28c   : > { %2319 = vpow2.f32 %v2133_v0  ;;  %v1465_v38 = vadd.f32 1.0, %v2308_v10  ;;  %v2310_v20 = vpop.eup %2309 }
 0x28d   : > { %2321 = vpow2.f32 %v2136_v3  ;;  %v1463_v23 = vadd.f32 1.0, %v2310_v20 }
 0x28e   : > { %2323 = vrcp.f32 %v1464_v6  ;;  %v2137_v6 = vmul.f32 -1.442695, %v3142_v33 }
 0x28f   : > { %1566 = vrot.lane.b32.xlu0 %v1528_v40, %s2400_s22  ;;  %1564 = vrot.lane.b32.xlu1 %v1527_v57, %s2400_s22  ;;  %2325 = vrcp.f32 %v1459_v8  ;;  %v1645_v57 = vpop.permute.xlu1 %1644  ;;  %v2138_v8 = vmul.f32 -1.442695, %v3150_v46 }
 0x290   : > { %2327 = vpow2.f32 %v2134_v11 }
 0x291   : > { %2329 = vrcp.f32 %v1462_v17 }
 0x292   : > { %2331 = vrcp.f32 %v1465_v38 }
 0x293   : > { %1570 = vrot.lane.b32.xlu0 %v1530_v61, %s2400_s22  ;;  %1568 = vrot.lane.b32.xlu1 %v1529_v15, %s2400_s22  ;;  %2333 = vrcp.f32 %v1463_v23 }
 0x295   : > { %v3185_v18 = vpop.eup %2311 }
 0x296   : > { %v2314_v25 = vpop.eup %2313  ;;  %v1684_v26 = vmul.f32 %v3185_v18, %v1639_v13 }
 0x297   : > { %1574 = vrot.lane.b32.xlu0 %v1532_v1, %s2400_s22  ;;  %1572 = vrot.lane.b32.xlu1 %v1531_v4, %s2400_s22  ;;  %v3189_v30 = vpop.eup %2315  ;;  %v1468_v37 = vadd.f32 1.0, %v2314_v25 }
 0x298   : > { %v3192_v31 = vpop.eup %2317  ;;  %v1682_v43 = vmul.f32 %v3189_v30, %v1635_v24 }
 0x299   : > { %v2320_v42 = vpop.eup %2319  ;;  %v1685_v48 = vmul.f32 %v3192_v31, %v1641_v22  ;;  %2335 = vrcp.f32 %v1468_v37 }
 0x29a   : > { %v2322_v47 = vpop.eup %2321  ;;  %v1466_v50 = vadd.f32 1.0, %v2320_v42 }
 0x29b   : > { %1578 = vrot.lane.b32.xlu0 %v1534_v9, %s2400_s22  ;;  %1576 = vrot.lane.b32.xlu1 %v1533_v12, %s2400_s22  ;;  %v3198_v49 = vpop.eup %2323  ;;  %v1469_v52 = vadd.f32 1.0, %v2322_v47  ;;  %v2140_v9 = vmul.f32 -1.442695, %v3145_v34 }
 0x29c   : > { %v3201_v51 = vpop.eup %2325  ;;  %v1688_v28 = vmul.f32 %v3198_v49, %v1647_v35  ;;  %2337 = vrcp.f32 %v1466_v50 }
 0x29d   : > { %v2328_v53 = vpop.eup %2327  ;;  %v1683_v41 = vmul.f32 %v3201_v51, %v1637_v54  ;;  %2339 = vrcp.f32 %v1469_v52 }
 0x29e   : > { %v3206_v55 = vpop.eup %2329  ;;  %v1467_v45 = vadd.f32 1.0, %v2328_v53 }
 0x29f   : > { %1582 = vrot.lane.b32.xlu0 %v1536_v19, %s2400_s22  ;;  %1580 = vrot.lane.b32.xlu1 %v1535_v21, %s2400_s22  ;;  %v3209_v39 = vpop.eup %2331  ;;  %v1686_v56 = vmul.f32 %v3206_v55, %v1643_v36 }
 0x2a0   : > { %v1689_v40 = vmul.f32 %v3209_v39, %v1649_v32  ;;  %v3215_v58 = vpop.eup %2333  ;;  %2341 = vrcp.f32 %v1467_v45 }
 0x2a1   : > { %v1687_v44 = vmul.f32 %v3215_v58, %v1645_v57  ;;  %2343 = vpow2.f32 %v2137_v6 }
 0x2a2   : > { %2345 = vpow2.f32 %v2139_v7 }
 0x2a3   : > { %1718 = vrot.lane.b32.xlu0 %v1684_v26, %s2400_s22  ;;  %1584 = vrot.lane.b32.xlu1 %v1537_v27, %s2400_s22  ;;  %2347 = vpow2.f32 %v2138_v8 }
 0x2a4   : > { %2349 = vpow2.f32 %v2140_v9 }
 0x2a6   : > { %v3219_v59 = vpop.eup %2335 }
 0x2a7   : > { %1714 = vrot.lane.b32.xlu0 %v1682_v43, %s2400_s22  ;;  %1720 = vrot.lane.b32.xlu1 %v1685_v48, %s2400_s22 }
 0x2a9   : > { %v3223_v15 = vpop.eup %2337 }
 0x2aa   : > { %v3225_v63 = vpop.eup %2339 }
 0x2ab   : > { %1726 = vrot.lane.b32.xlu0 %v1688_v28, %s2400_s22  ;;  %1716 = vrot.lane.b32.xlu1 %v1683_v41, %s2400_s22 }
 0x2ad   : > { %v3231_v2 = vpop.eup %2341 }
 0x2ae   : > { %v2344_v10 = vpop.eup %2343 }
 0x2af   : > { %1722 = vrot.lane.b32.xlu0 %v1686_v56, %s2400_s22  ;;  %1728 = vrot.lane.b32.xlu1 %v1689_v40, %s2400_s22  ;;  %v1470_v11 = vadd.f32 1.0, %v2344_v10  ;;  %v2346_v12 = vpop.eup %2345 }
 0x2b0   : > { %v2348_v13 = vpop.eup %2347  ;;  %v1472_v17 = vadd.f32 1.0, %v2346_v12 }
 0x2b1   : > { %2351 = vrcp.f32 %v1470_v11  ;;  %v1471_v38 = vadd.f32 1.0, %v2348_v13  ;;  %v2350_v19 = vpop.eup %2349 }
 0x2b2   : > { %2353 = vrcp.f32 %v1472_v17  ;;  %v1473_v33 = vadd.f32 1.0, %v2350_v19 }
 0x2b3   : > { %1724 = vrot.lane.b32.xlu1 %v1687_v44, %s2400_s22  ;;  %2355 = vrcp.f32 %v1471_v38  ;;  %v1602_v44 = vmul.f32 %v3189_v30, %v3175_v5 }
 0x2b4   : > { %2357 = vrcp.f32 %v1473_v33 }
 0x2b5   : > { %v1655_v60 = vpop.permute.xlu0 %1654 }
 0x2b6   : > { %v1692_v61 = vmul.f32 %v3219_v59, %v1655_v60 }
 0x2b8   : > { %1734 = vrot.lane.b32.xlu0 %v1692_v61, %s2400_s22 }
 0x2b9   : > { %v1651_v62 = vpop.permute.xlu0 %1650  ;;  %v1657_v0 = vpop.permute.xlu1 %1656 }
 0x2ba   : > { %v1690_v14 = vmul.f32 %v3223_v15, %v1651_v62  ;;  %v1693_v1 = vmul.f32 %v3225_v63, %v1657_v0 }
 0x2bc   : > { %1730 = vrot.lane.b32.xlu0 %v1690_v14, %s2400_s22  ;;  %1736 = vrot.lane.b32.xlu1 %v1693_v1, %s2400_s22 }
 0x2bd   : > { %v1653_v3 = vpop.permute.xlu1 %1652 }
 0x2be   : > { %v1691_v4 = vmul.f32 %v3231_v2, %v1653_v3  ;;  %v3239_v20 = vpop.eup %2351  ;;  %v1603_v3 = vmul.f32 %v3201_v51, %v3180_v16 }
 0x2bf   : > { %v3243_v22 = vpop.eup %2353 }
 0x2c0   : > { %1732 = vrot.lane.b32.xlu1 %v1691_v4, %s2400_s22  ;;  %v3245_v24 = vpop.eup %2355 }
 0x2c1   : > { %v3251_v35 = vpop.eup %2357 }
 0x2f1   : > { %v1663_v29 = vpop.permute.xlu0 %1662 }
 0x2f2   : > { %v1696_v25 = vmul.f32 %v3243_v22, %v1663_v29 }
 0x2f5   : > { %v1659_v46 = vpop.permute.xlu0 %1658  ;;  %v1665_v21 = vpop.permute.xlu1 %1664 }
 0x2f6   : > { %v1694_v34 = vmul.f32 %v3239_v20, %v1659_v46  ;;  %v1697_v43 = vmul.f32 %v3251_v35, %v1665_v21 }
 0x2f8   : > { %1738 = vrot.lane.b32.xlu0 %v1694_v34, %s2400_s22 }
 0x2f9   : > { %v1559_v23 = vpop.permute.xlu0 %1558  ;;  %v1661_v26 = vpop.permute.xlu1 %1660 }
 0x2fa   : > { %v1695_v27 = vmul.f32 %v3245_v24, %v1661_v26  ;;  %v1604_v45 = vmul.f32 %v3185_v18, %v1559_v23 }
 0x2fc   : > { %1742 = vrot.lane.b32.xlu0 %v1696_v25, %s2400_s22  ;;  %1740 = vrot.lane.b32.xlu1 %v1695_v27, %s2400_s22 }
 0x2fd   : > { %v1563_v37 = vpop.permute.xlu0 %1562  ;;  %v1561_v42 = vpop.permute.xlu1 %1560 }
 0x2fe   : > { %v1605_v60 = vmul.f32 %v3192_v31, %v1561_v42  ;;  %v1606_v8 = vmul.f32 %v3206_v55, %v1563_v37 }
 0x300   : > { %1744 = vrot.lane.b32.xlu1 %v1697_v43, %s2400_s22 }
 0x301   : > { %v1567_v54 = vpop.permute.xlu0 %1566  ;;  %v1565_v47 = vpop.permute.xlu1 %1564 }
 0x302   : > { %v1608_v1 = vmul.f32 %v3198_v49, %v1567_v54  ;;  %v1607_v17 = vmul.f32 %v3215_v58, %v1565_v47 }
 0x305   : > { %v1571_v48 = vpop.permute.xlu0 %1570  ;;  %v1569_v50 = vpop.permute.xlu1 %1568 }
 0x306   : > { %v1609_v9 = vmul.f32 %v3209_v39, %v1569_v50  ;;  %v1610_v25 = vmul.f32 %v3223_v15, %v1571_v48 }
 0x309   : > { %v1575_v52 = vpop.permute.xlu0 %1574  ;;  %v3255_v28 = vpop.permute.xlu1 %1572 }
 0x30a   : > { %v1612_v29 = vmul.f32 %v3219_v59, %v1575_v52  ;;  %v1611_v52 = vmul.f32 %v3231_v2, %v3255_v28 }
 0x30d   : > { %v3257_v32 = vpop.permute.xlu0 %1578  ;;  %v1577_v53 = vpop.permute.xlu1 %1576 }
 0x30e   : > { %v1613_v27 = vmul.f32 %v3225_v63, %v1577_v53 }
 0x311   : > { %v3259_v41 = vpop.permute.xlu0 %1582  ;;  %v3261_v36 = vpop.permute.xlu1 %1580 }
 0x315   : > { %v1719_v56 = vpop.permute.xlu0 %1718  ;;  %v3266_v57 = vpop.permute.xlu1 %1584 }
 0x316   : > { %v3264_v40 = vadd.f32 %v1719_v56, %v1604_v45 }
 0x318   : > { %2359 = vtanh.f32 %v3264_v40 }
 0x319   : > { %v1715_v61 = vpop.permute.xlu0 %1714  ;;  %v1721_v14 = vpop.permute.xlu1 %1720 }
 0x31a   : > { %v1762_v62 = vadd.f32 %v1715_v61, %v1602_v44  ;;  %v3272_v0 = vadd.f32 %v1721_v14, %v1605_v60 }
 0x31c   : > { %2361 = vtanh.f32 %v1762_v62  ;;  %1890 = vrot.lane.b32.xlu0 %v1762_v62, %s2409_s25  ;;  %v1616_v62 = vmul.f32 %v3243_v22, %v3259_v41 }
 0x31d   : > { %2363 = vtanh.f32 %v3272_v0  ;;  %v1727_v5 = vpop.permute.xlu0 %1726  ;;  %v1717_v6 = vpop.permute.xlu1 %1716 }
 0x31e   : > { %v3279_v4 = vadd.f32 %v1727_v5, %v1608_v1  ;;  %v1763_v7 = vadd.f32 %v1717_v6, %v1603_v3  ;;  %v1614_v1 = vmul.f32 %v3239_v20, %v3257_v32 }
 0x320   : > { %2365 = vtanh.f32 %v3279_v4  ;;  %1892 = vrot.lane.b32.xlu1 %v1763_v7, %s2409_s25 }
 0x321   : > { %2367 = vtanh.f32 %v1763_v7  ;;  %v1723_v10 = vpop.permute.xlu0 %1722  ;;  %v1729_v16 = vpop.permute.xlu1 %1728  ;;  %v1617_v7 = vmul.f32 %v3251_v35, %v3266_v57 }
 0x322   : > { %v3285_v11 = vadd.f32 %v1723_v10, %v1606_v8  ;;  %v3287_v12 = vadd.f32 %v1729_v16, %v1609_v9  ;;  %v1615_v9 = vmul.f32 %v3245_v24, %v3261_v36 }
 0x324   : > { %2369 = vtanh.f32 %v3285_v11 }
 0x325   : > { %v2360_v13 = vpop.eup %2359  ;;  %2371 = vtanh.f32 %v3287_v12  ;;  %v1725_v38 = vpop.permute.xlu1 %1724 }
 0x326   : > { %1814 = vrot.lane.b32.xlu0 %v2360_v13, %s2400_s22  ;;  %v3293_v19 = vadd.f32 %v1725_v38, %v1607_v17 }
 0x328   : > { %2373 = vtanh.f32 %v3293_v19 }
 0x329   : > { %v2362_v33 = vpop.eup %2361 }
 0x32a   : > { %v2364_v46 = vpop.eup %2363  ;;  %v1735_v34 = vpop.permute.xlu0 %1734  ;;  %1810 = vrot.lane.b32.xlu0 %v2362_v33, %s2400_s22 }
 0x32b   : > { %v3298_v21 = vadd.f32 %v1735_v34, %v1612_v29  ;;  %1816 = vrot.lane.b32.xlu1 %v2364_v46, %s2400_s22 }
 0x32d   : > { %v2366_v23 = vpop.eup %2365  ;;  %2375 = vtanh.f32 %v3298_v21 }
 0x32e   : > { %v2368_v26 = vpop.eup %2367  ;;  %v1731_v37 = vpop.permute.xlu0 %1730  ;;  %1822 = vrot.lane.b32.xlu0 %v2366_v23, %s2400_s22 }
 0x32f   : > { %v1770_v42 = vadd.f32 %v1731_v37, %v1610_v25  ;;  %v1737_v43 = vpop.permute.xlu1 %1736  ;;  %1812 = vrot.lane.b32.xlu1 %v2368_v26, %s2400_s22 }
 0x330   : > { %v1773_v54 = vadd.f32 %v1737_v43, %v1613_v27 }
 0x331   : > { %v2370_v47 = vpop.eup %2369  ;;  %2377 = vtanh.f32 %v1770_v42 }
 0x332   : > { %v2372_v50 = vpop.eup %2371  ;;  %2379 = vtanh.f32 %v1773_v54  ;;  %1818 = vrot.lane.b32.xlu0 %v2370_v47, %s2400_s22 }
 0x333   : > { %v1733_v48 = vpop.permute.xlu1 %1732  ;;  %1824 = vrot.lane.b32.xlu1 %v2372_v50, %s2400_s22 }
 0x334   : > { %v1771_v53 = vadd.f32 %v1733_v48, %v1611_v52 }
 0x335   : > { %v2374_v45 = vpop.eup %2373 }
 0x336   : > { %2381 = vtanh.f32 %v1771_v53 }
 0x337   : > { %1820 = vrot.lane.b32.xlu1 %v2374_v45, %s2400_s22 }
 0x33a   : > { %v2376_v56 = vpop.eup %2375 }
 0x33b   : > { %1830 = vrot.lane.b32.xlu0 %v2376_v56, %s2400_s22 }
 0x33e   : > { %v2378_v44 = vpop.eup %2377 }
 0x33f   : > { %v2380_v60 = vpop.eup %2379  ;;  %1826 = vrot.lane.b32.xlu0 %v2378_v44, %s2400_s22 }
 0x340   : > { %1832 = vrot.lane.b32.xlu1 %v2380_v60, %s2400_s22 }
 0x343   : > { %v2382_v28 = vpop.eup %2381 }
 0x344   : > { %1828 = vrot.lane.b32.xlu1 %v2382_v28, %s2400_s22 }
 0x36a   : > { %v1739_v61 = vpop.permute.xlu0 %1738 }
 0x36b   : > { %v1774_v6 = vadd.f32 %v1739_v61, %v1614_v1 }
 0x36e   : > { %v1743_v14 = vpop.permute.xlu0 %1742  ;;  %v1741_v5 = vpop.permute.xlu1 %1740 }
 0x36f   : > { %v1776_v3 = vadd.f32 %v1743_v14, %v1616_v62  ;;  %v1775_v16 = vadd.f32 %v1741_v5, %v1615_v9 }
 0x371   : > { %2383 = vtanh.f32 %v1776_v3 }
 0x372   : > { %v1745_v8 = vpop.permute.xlu1 %1744  ;;  %2385 = vtanh.f32 %v1774_v6 }
 0x373   : > { %v1777_v10 = vadd.f32 %v1745_v8, %v1617_v7 }
 0x375   : > { %2387 = vtanh.f32 %v1777_v10 }
 0x376   : > { %2389 = vtanh.f32 %v1775_v16 }
 0x37e   : > { %v2384_v41 = vpop.eup %2383 }
 0x37f   : > { %1838 = vrot.lane.b32.xlu0 %v2384_v41, %s2400_s22  ;;  %v2386_v32 = vpop.eup %2385 }
 0x382   : > { %v2388_v13 = vpop.eup %2387 }
 0x383   : > { %1834 = vrot.lane.b32.xlu0 %v2386_v32, %s2400_s22  ;;  %1840 = vrot.lane.b32.xlu1 %v2388_v13, %s2400_s22  ;;  %v2390_v17 = vpop.eup %2389 }
 0x387   : > { %1894 = vrot.lane.b32.xlu0 %v3264_v40, %s2409_s25  ;;  %1836 = vrot.lane.b32.xlu1 %v2390_v17, %s2400_s22  ;;  %s2410_s22 = smov 112  }
 0x38b   : > { %1898 = vrot.lane.b32.xlu0 %v3285_v11, %s2409_s25  ;;  %1896 = vrot.lane.b32.xlu1 %v3272_v0, %s2409_s25 }
 0x38e   : > { %v1891_v36 = vpop.permute.xlu0 %1890 }
 0x38f   : > { %1938 = vst.msk [vmem:[#allocation4] sm:$0xff] %vm286_vm4, %v1891_v36  ;;  %1902 = vrot.lane.b32.xlu0 %v3279_v4, %s2409_s25  ;;  %1900 = vrot.lane.b32.xlu1 %v3293_v19, %s2409_s25 }
 0x392   : > { %v1893_v57 = vpop.permute.xlu1 %1892 }
 0x393   : > { %1906 = vrot.lane.b32.xlu0 %v1770_v42, %s2409_s25  ;;  %1939 = vst.msk [vmem:[#allocation4 + $0x8] sm:$0xff] %vm286_vm4, %v1893_v57  ;;  %1904 = vrot.lane.b32.xlu1 %v3287_v12, %s2409_s25 }
 0x397   : > { %1910 = vrot.lane.b32.xlu0 %v3298_v21, %s2409_s25  ;;  %1908 = vrot.lane.b32.xlu1 %v1771_v53, %s2409_s25 }
 0x398   : > { %v1815_v40 = vpop.permute.xlu0 %1814 }
 0x399   : > { %v1860_v11 = vmul.f32 %v3185_v18, %v1815_v40 }
 0x39b   : > { %1914 = vrot.lane.b32.xlu0 %v1774_v6, %s2409_s25  ;;  %1912 = vrot.lane.b32.xlu1 %v1773_v54, %s2409_s25 }
 0x39c   : > { %v1811_v0 = vpop.permute.xlu0 %1810 }
 0x39d   : > { %v1817_v4 = vpop.permute.xlu1 %1816  ;;  %v1858_v19 = vmul.f32 %v3189_v30, %v1811_v0 }
 0x39e   : > { %v1861_v33 = vmul.f32 %v3192_v31, %v1817_v4 }
 0x39f   : > { %1918 = vrot.lane.b32.xlu0 %v1776_v3, %s2409_s25  ;;  %1916 = vrot.lane.b32.xlu1 %v1775_v16, %s2409_s25 }
 0x3a0   : > { %v1823_v12 = vpop.permute.xlu0 %1822 }
 0x3a1   : > { %v1813_v38 = vpop.permute.xlu1 %1812  ;;  %v1864_v46 = vmul.f32 %v3198_v49, %v1823_v12 }
 0x3a2   : > { %v1859_v18 = vmul.f32 %v3201_v51, %v1813_v38 }
 0x3a3   : > { %1974 = vrot.lane.b32.xlu0 %v1860_v11, %s2410_s22  ;;  %1920 = vrot.lane.b32.xlu1 %v1777_v10, %s2409_s25 }
 0x3a4   : > { %v1819_v34 = vpop.permute.xlu0 %1818 }
 0x3a5   : > { %v1825_v29 = vpop.permute.xlu1 %1824  ;;  %v1862_v21 = vmul.f32 %v3206_v55, %v1819_v34 }
 0x3a6   : > { %v1865_v30 = vmul.f32 %v3209_v39, %v1825_v29 }
 0x3a7   : > { %1970 = vrot.lane.b32.xlu0 %v1858_v19, %s2410_s22  ;;  %1976 = vrot.lane.b32.xlu1 %v1861_v33, %s2410_s22 }
 0x3a9   : > { %v1821_v31 = vpop.permute.xlu1 %1820 }
 0x3aa   : > { %v1863_v49 = vmul.f32 %v3215_v58, %v1821_v31 }
 0x3ab   : > { %1982 = vrot.lane.b32.xlu0 %v1864_v46, %s2410_s22  ;;  %1972 = vrot.lane.b32.xlu1 %v1859_v18, %s2410_s22 }
 0x3ad   : > { %v1831_v23 = vpop.permute.xlu0 %1830 }
 0x3ae   : > { %v1868_v25 = vmul.f32 %v3219_v59, %v1831_v23 }
 0x3af   : > { %1978 = vrot.lane.b32.xlu0 %v1862_v21, %s2410_s22  ;;  %1984 = vrot.lane.b32.xlu1 %v1865_v30, %s2410_s22 }
 0x3b1   : > { %v1827_v26 = vpop.permute.xlu0 %1826 }
 0x3b2   : > { %v1833_v51 = vpop.permute.xlu1 %1832  ;;  %v1866_v55 = vmul.f32 %v3223_v15, %v1827_v26 }
 0x3b3   : > { %1990 = vrot.lane.b32.xlu0 %v1868_v25, %s2410_s22  ;;  %1980 = vrot.lane.b32.xlu1 %v1863_v49, %s2410_s22  ;;  %v1869_v27 = vmul.f32 %v3225_v63, %v1833_v51 }
 0x3b6   : > { %v1829_v39 = vpop.permute.xlu1 %1828 }
 0x3b7   : > { %1986 = vrot.lane.b32.xlu0 %v1866_v55, %s2410_s22  ;;  %1992 = vrot.lane.b32.xlu1 %v1869_v27, %s2410_s22  ;;  %v1867_v37 = vmul.f32 %v3231_v2, %v1829_v39 }
 0x3bb   : > { %1988 = vrot.lane.b32.xlu1 %v1867_v37, %s2410_s22 }
 0x3f1   : > { %v1839_v58 = vpop.permute.xlu0 %1838 }
 0x3f2   : > { %v1872_v15 = vmul.f32 %v3243_v22, %v1839_v58 }
 0x3f5   : > { %v1835_v59 = vpop.permute.xlu0 %1834  ;;  %v1841_v43 = vpop.permute.xlu1 %1840 }
 0x3f6   : > { %v1870_v42 = vmul.f32 %v3239_v20, %v1835_v59  ;;  %v1873_v20 = vmul.f32 %v3251_v35, %v1841_v43 }
 0x3f8   : > { %1994 = vrot.lane.b32.xlu0 %v1870_v42, %s2410_s22 }
 0x3f9   : > { %v1895_v54 = vpop.permute.xlu0 %1894  ;;  %v1837_v63 = vpop.permute.xlu1 %1836 }
 0x3fa   : > { %1940 = vst.msk [vmem:[#allocation4 + $0x10] sm:$0xff] %vm286_vm4, %v1895_v54  ;;  %v1871_v47 = vmul.f32 %v3245_v24, %v1837_v63 }
 0x3fc   : > { %1998 = vrot.lane.b32.xlu0 %v1872_v15, %s2410_s22  ;;  %1996 = vrot.lane.b32.xlu1 %v1871_v47, %s2410_s22 }
 0x3fd   : > { %v1899_v2 = vpop.permute.xlu0 %1898  ;;  %v1897_v50 = vpop.permute.xlu1 %1896 }
 0x3fe   : > { %1942 = vst.msk [vmem:[#allocation4 + $0x20] sm:$0xff] %vm286_vm4, %v1899_v2  ;;  %1941 = vst.msk [vmem:[#allocation4 + $0x18] sm:$0xff] %vm286_vm4, %v1897_v50 }
 0x400   : > { %2000 = vrot.lane.b32.xlu1 %v1873_v20, %s2410_s22 }
 0x401   : > { %v1903_v22 = vpop.permute.xlu0 %1902  ;;  %v1901_v52 = vpop.permute.xlu1 %1900 }
 0x402   : > { %1944 = vst.msk [vmem:[#allocation4 + $0x30] sm:$0xff] %vm286_vm4, %v1903_v22  ;;  %1943 = vst.msk [vmem:[#allocation4 + $0x28] sm:$0xff] %vm286_vm4, %v1901_v52 }
 0x405   : > { %v1907_v24 = vpop.permute.xlu0 %1906  ;;  %v1905_v48 = vpop.permute.xlu1 %1904 }
 0x406   : > { %1946 = vst.msk [vmem:[#allocation4 + $0x40] sm:$0xff] %vm286_vm4, %v1907_v24  ;;  %1945 = vst.msk [vmem:[#allocation4 + $0x38] sm:$0xff] %vm286_vm4, %v1905_v48 }
 0x409   : > { %v1911_v53 = vpop.permute.xlu0 %1910  ;;  %v1909_v35 = vpop.permute.xlu1 %1908 }
 0x40a   : > { %1948 = vst.msk [vmem:[#allocation4 + $0x50] sm:$0xff] %vm286_vm4, %v1911_v53  ;;  %1947 = vst.msk [vmem:[#allocation4 + $0x48] sm:$0xff] %vm286_vm4, %v1909_v35 }
 0x40d   : > { %v1915_v45 = vpop.permute.xlu0 %1914  ;;  %v1913_v56 = vpop.permute.xlu1 %1912 }
 0x40e   : > { %1950 = vst.msk [vmem:[#allocation4 + $0x60] sm:$0xff] %vm286_vm4, %v1915_v45  ;;  %1949 = vst.msk [vmem:[#allocation4 + $0x58] sm:$0xff] %vm286_vm4, %v1913_v56 }
 0x411   : > { %v1919_v44 = vpop.permute.xlu0 %1918  ;;  %v1917_v60 = vpop.permute.xlu1 %1916 }
 0x412   : > { %1952 = vst.msk [vmem:[#allocation4 + $0x70] sm:$0xff] %vm286_vm4, %v1919_v44  ;;  %1951 = vst.msk [vmem:[#allocation4 + $0x68] sm:$0xff] %vm286_vm4, %v1917_v60 }
 0x415   : > { %v1975_v28 = vpop.permute.xlu0 %1974  ;;  %v1921_v61 = vpop.permute.xlu1 %1920 }
 0x416   : > { %2021 = vst.msk [vmem:[#allocation2 + $0x31] sm:$0xff] %vm286_vm4, %v1975_v28  ;;  %1953 = vst.msk [vmem:[#allocation4 + $0x78] sm:$0xff] %vm286_vm4, %v1921_v61 }
 0x419   : > { %v1971_v62 = vpop.permute.xlu0 %1970  ;;  %v1977_v14 = vpop.permute.xlu1 %1976 }
 0x41a   : > { %2019 = vst.msk [vmem:[#allocation2 + $0x11] sm:$0xff] %vm286_vm4, %v1971_v62  ;;  %2022 = vst.msk [vmem:[#allocation2 + $0x41] sm:$0xff] %vm286_vm4, %v1977_v14 }
 0x41d   : > { %v1983_v1 = vpop.permute.xlu0 %1982  ;;  %v1973_v3 = vpop.permute.xlu1 %1972 }
 0x41e   : > { %2025 = vst.msk [vmem:[#allocation2 + $0x71] sm:$0xff] %vm286_vm4, %v1983_v1  ;;  %2020 = vst.msk [vmem:[#allocation2 + $0x21] sm:$0xff] %vm286_vm4, %v1973_v3 }
 0x421   : > { %v1979_v5 = vpop.permute.xlu0 %1978  ;;  %v1985_v6 = vpop.permute.xlu1 %1984 }
 0x422   : > { %2023 = vst.msk [vmem:[#allocation2 + $0x51] sm:$0xff] %vm286_vm4, %v1979_v5  ;;  %2026 = vst.msk [vmem:[#allocation2 + $0x81] sm:$0xff] %vm286_vm4, %v1985_v6 }
 0x425   : > { %v1991_v7 = vpop.permute.xlu0 %1990  ;;  %v1981_v8 = vpop.permute.xlu1 %1980 }
 0x426   : > { %2029 = vst.msk [vmem:[#allocation2 + $0xd1] sm:$0xff] %vm286_vm4, %v1991_v7  ;;  %2024 = vst.msk [vmem:[#allocation2 + $0x61] sm:$0xff] %vm286_vm4, %v1981_v8 }
 0x429   : > { %v1987_v9 = vpop.permute.xlu0 %1986  ;;  %v1993_v10 = vpop.permute.xlu1 %1992 }
 0x42a   : > { %2027 = vst.msk [vmem:[#allocation2 + $0xb1] sm:$0xff] %vm286_vm4, %v1987_v9  ;;  %2030 = vst.msk [vmem:[#allocation2 + $0xe1] sm:$0xff] %vm286_vm4, %v1993_v10 }
 0x42d   : > { %v1989_v16 = vpop.permute.xlu1 %1988 }
 0x42e   : > { %2028 = vst.msk [vmem:[#allocation2 + $0xc1] sm:$0xff] %vm286_vm4, %v1989_v16 }
 0x46a   : > { %v1995_v41 = vpop.permute.xlu0 %1994 }
 0x46b   : > { %2031 = vst.msk [vmem:[#allocation2 + $0xf1] sm:$0xff] %vm286_vm4, %v1995_v41 }
 0x46e   : > { %v1999_v32 = vpop.permute.xlu0 %1998  ;;  %v1997_v13 = vpop.permute.xlu1 %1996 }
 0x46f   : > { %2033 = vst.msk [vmem:[#allocation2 + $0x111] sm:$0xff] %vm286_vm4, %v1999_v32  ;;  %2032 = vst.msk [vmem:[#allocation2 + $0x101] sm:$0xff] %vm286_vm4, %v1997_v13  ;;  %2038 = sbr.rel (%p2141_p5) target bundleno = 1148 (0x47c), region = 44 }
 0x472   : > { %v2001_v17 = vpop.permute.xlu1 %2000 }
 0x473   : > { %2034 = vst.msk [vmem:[#allocation2 + $0x121] sm:$0xff] %vm286_vm4, %v2001_v17 }
 0x474   : > { %2039 = vst.msk [vmem:[%s3484_s4] sm:$0xff] %vm286_vm4, %v1971_v62  ;;  %2040 = vst.msk [vmem:[%s3484_s4 + $0x8] sm:$0xff] %vm286_vm4, %v1973_v3 }
 0x475   : > { %2041 = vst.msk [vmem:[%s3484_s4 + $0x10] sm:$0xff] %vm286_vm4, %v1975_v28  ;;  %2042 = vst.msk [vmem:[%s3484_s4 + $0x18] sm:$0xff] %vm286_vm4, %v1977_v14 }
 0x476   : > { %2043 = vst.msk [vmem:[%s3484_s4 + $0x20] sm:$0xff] %vm286_vm4, %v1979_v5  ;;  %2044 = vst.msk [vmem:[%s3484_s4 + $0x28] sm:$0xff] %vm286_vm4, %v1981_v8 }
 0x477   : > { %2045 = vst.msk [vmem:[%s3484_s4 + $0x30] sm:$0xff] %vm286_vm4, %v1983_v1  ;;  %2046 = vst.msk [vmem:[%s3484_s4 + $0x38] sm:$0xff] %vm286_vm4, %v1985_v6 }
 0x478   : > { %2047 = vst.msk [vmem:[%s3484_s4 + $0x40] sm:$0xff] %vm286_vm4, %v1987_v9  ;;  %2048 = vst.msk [vmem:[%s3484_s4 + $0x48] sm:$0xff] %vm286_vm4, %v1989_v16 }
 0x479   : > { %2049 = vst.msk [vmem:[%s3484_s4 + $0x50] sm:$0xff] %vm286_vm4, %v1991_v7  ;;  %2050 = vst.msk [vmem:[%s3484_s4 + $0x58] sm:$0xff] %vm286_vm4, %v1993_v10 }
 0x47a   : > { %2051 = vst.msk [vmem:[%s3484_s4 + $0x60] sm:$0xff] %vm286_vm4, %v1995_v41  ;;  %2052 = vst.msk [vmem:[%s3484_s4 + $0x68] sm:$0xff] %vm286_vm4, %v1997_v13 }
 0x47b   : > { %2053 = vst.msk [vmem:[%s3484_s4 + $0x70] sm:$0xff] %vm286_vm4, %v1999_v32  ;;  %2054 = vst.msk [vmem:[%s3484_s4 + $0x78] sm:$0xff] %vm286_vm4, %v2001_v17 }
 0x47c PF: > { %s14_s15 = sadd.s32 1, %s2397_s15  }
 0x47d   : > { %p11_p6 = scmp.ge.s32.totalorder %s14_s15, 5  }
 0x47f   :  { %13 = sbr.rel (!%p11_p6) target bundleno = 1 (0x1), region = 71 }

</bundles_post_ra>
